<compile_context>
chip_gen: v7x
topology: tpu7x:2x2x1
jax: 0.10.0
libtpu: 0.0.40
codegen_flags: <defaults>
</compile_context>

<pallas_src>
import functools

import jax
import jax.numpy as jnp
from jax.experimental import pallas as pl
from jax.experimental.pallas import tpu as pltpu

# Resolved on first call: can Mosaic lower the sublane->lane relayout?
_LANE_DENSE_OK = None


def _ccl_kernel(x1_ref, x2_ref, lbl_ref, dist_ref, per_ref, *,
                margin: float, scale: float, lane_dense: bool, rows128: int):
    # Upcast inside VMEM so HBM reads stay at the input dtype width (e.g. bf16).
    x1 = x1_ref[...].astype(jnp.float32)            # (TN, D)
    x2 = x2_ref[...].astype(jnp.float32)            # (TN, D)

    # Three lane-axis reductions per row.
    s1 = jnp.sum(x1 * x1, axis=1, keepdims=True)    # (TN, 1)
    s2 = jnp.sum(x2 * x2, axis=1, keepdims=True)    # (TN, 1)
    dt = jnp.sum(x1 * x2, axis=1, keepdims=True)    # (TN, 1)

    if lane_dense:
        # Relayout the per-row scalars to dense (TN//128, 128) tiles so the
        # whole epilogue and both stores run at full lane width.
        s1 = s1.reshape(rows128, 128)
        s2 = s2.reshape(rows128, 128)
        dt = dt.reshape(rows128, 128)
        lbl = lbl_ref[...].reshape(rows128, 128)
    else:
        lbl = lbl_ref[...]                          # (TN, 1)

    # cos = <x1,x2> / (||x1|| * ||x2||); zero-norm rows stay NaN exactly like
    # the torch normalize-then-cosine composition.
    cos = dt * jax.lax.rsqrt(s1 * s2)
    dist = scale * (1.0 - cos + 1e-8)
    hinge = jnp.maximum(margin - dist, 0.0)
    per = (1.0 - lbl) * (dist * dist) + lbl * (hinge * hinge)

    if lane_dense:
        dist_ref[...] = dist.reshape(1, rows128, 128)
        per_ref[...] = per.reshape(1, rows128, 128)
    else:
        dist_ref[...] = dist
        per_ref[...] = per


def _tile_rows(n, d, in_itemsize, *, budget_bytes=20 << 20, cap=4096):
    """Largest row tile (multiple of 128, <= cap) whose pipeline footprint
    (double-buffered inputs + f32 intermediates + skinny blocks) fits a budget
    that is portable across v5e/v6e (128 MiB VMEM) and v7x (64 MiB)."""
    per_row = (2 * 2 * d * in_itemsize   # x1, x2, double-buffered
               + 3 * d * 4               # f32 upcasts + one live product
               + 3 * 2 * 512)            # label/dist/per (worst-case lane pad)
    tn = min(cap, budget_bytes // per_row)
    return max(128, (int(tn) // 128) * 128)


def _vmem_limit_bytes(tn, d, in_itemsize):
    footprint = tn * (2 * 2 * d * in_itemsize + 3 * d * 4 + 3 * 2 * 512)
    return int(min(48 << 20, max(32 << 20, footprint * 13 // 10)))


def _forward(x1, x2, lbl_flat, *, d, tn, num_tiles, margin, scale, lane_dense):
    n_pad = num_tiles * tn
    rows128 = tn // 128
    in_itemsize = jnp.dtype(x1.dtype).itemsize

    kernel = functools.partial(_ccl_kernel, margin=float(margin),
                               scale=float(scale), lane_dense=lane_dense,
                               rows128=rows128)
    x_spec = pl.BlockSpec((tn, d), lambda i: (i, 0))
    if lane_dense:
        lbl_in = lbl_flat.reshape(num_tiles, rows128, 128)
        skinny = pl.BlockSpec((1, rows128, 128), lambda i: (i, 0, 0))
        skinny_shape = jax.ShapeDtypeStruct((num_tiles, rows128, 128),
                                            jnp.float32)
    else:
        lbl_in = lbl_flat.reshape(n_pad, 1)
        skinny = pl.BlockSpec((tn, 1), lambda i: (i, 0))
        skinny_shape = jax.ShapeDtypeStruct((n_pad, 1), jnp.float32)

    cost = pl.CostEstimate(
        flops=n_pad * (6 * d + 12),
        transcendentals=n_pad,
        bytes_accessed=2 * n_pad * d * in_itemsize + 3 * n_pad * 4,
    )
    dist_raw, per_raw = pl.pallas_call(
        kernel,
        grid=(num_tiles,),
        in_specs=[x_spec, x_spec, skinny],
        out_specs=(skinny, skinny),
        out_shape=(skinny_shape, skinny_shape),
        compiler_params=pltpu.CompilerParams(
            dimension_semantics=("parallel",),
            vmem_limit_bytes=_vmem_limit_bytes(tn, d, in_itemsize)),
        cost_estimate=cost,
    )(x1, x2, lbl_in)
    return dist_raw.reshape(-1), per_raw.reshape(-1)


def cosine_contrastive_loss(output1, output2, label, margin=0.2, scale=10.0,
                            tile_rows=None):
    """Returns (loss_scalar, cosine_distance[N]) — matches the torch module
    (float32 instead of float64)."""
    global _LANE_DENSE_OK
    n, d = output1.shape
    in_itemsize = jnp.dtype(output1.dtype).itemsize

    cap_n = ((n + 127) // 128) * 128
    if tile_rows is not None:
        tn = max(128, (int(tile_rows) // 128) * 128)
    else:
        tn = _tile_rows(n, d, in_itemsize)
        if n >= 256:
            # Keep >= 2 grid steps when there is enough work so both v7x
            # TensorCores (megacore "parallel" axis) are used.
            tn = min(tn, max(128, ((pl.cdiv(n, 2) + 127) // 128) * 128))
    tn = min(tn, cap_n)
    num_tiles = pl.cdiv(n, tn)
    n_pad = num_tiles * tn

    # Only the label (N*4 bytes) is ever padded; x1/x2 are never copied.
    lbl_flat = jnp.pad(label.reshape(-1).astype(jnp.float32), (0, n_pad - n))

    kwargs = dict(d=d, tn=tn, num_tiles=num_tiles, margin=margin, scale=scale)
    dist_flat = per_flat = None
    if _LANE_DENSE_OK is not False:
        try:
            dist_flat, per_flat = _forward(output1, output2, lbl_flat,
                                           lane_dense=True, **kwargs)
            if _LANE_DENSE_OK is None:
                jax.block_until_ready((dist_flat, per_flat))
            _LANE_DENSE_OK = True
        except Exception:
            # This Mosaic build can't lower the sublane->lane relayout; fall
            # back (once, cached) to the always-supported column layout.
            _LANE_DENSE_OK = False
    if _LANE_DENSE_OK is False:
        dist_flat, per_flat = _forward(output1, output2, lbl_flat,
                                       lane_dense=False, **kwargs)

    # Mean over the true N rows only (ragged-tile garbage rows sliced away).
    loss = jnp.mean(per_flat[:n])
    return loss, dist_flat[:n]


def _reference(output1, output2, label, margin=0.2, scale=10.0):
    # Pure-JAX reference mirroring the PyTorch forward (in f32).
    o1 = output1.astype(jnp.float32)
    o2 = output2.astype(jnp.float32)
    o1 = o1 / jnp.linalg.norm(o1, axis=1, keepdims=True)
    o2 = o2 / jnp.linalg.norm(o2, axis=1, keepdims=True)
    dot = jnp.sum(o1 * o2, axis=1)
    denom = jnp.maximum(
        jnp.linalg.norm(o1, axis=1) * jnp.linalg.norm(o2, axis=1), 1e-8)
    cos = dot / denom
    dist = scale * (1.0 - cos + 1e-8)
    loss = jnp.mean((1.0 - label) * dist ** 2
                    + label * jnp.maximum(margin - dist, 0.0) ** 2)
    return loss, dist


if __name__ == "__main__":
    key = jax.random.PRNGKey(0)
    k1, k2, k3 = jax.random.split(key, 3)

    N, D = 200, 128  # batch, embedding dim
    output1 = jax.random.normal(k1, (N, D), dtype=jnp.bfloat16)
    output2 = jax.random.normal(k2, (N, D), dtype=jnp.bfloat16)
    label = jax.random.bernoulli(k3, 0.5, (N,)).astype(jnp.float32)

    ref_loss, ref_dist = _reference(output1, output2, label)

    # Multi-tile path with a ragged last tile (200 rows, 128-row tiles).
    loss, dist = cosine_contrastive_loss(output1, output2, label, tile_rows=128)
    jax.block_until_ready((loss, dist))
    assert dist.shape == (N,)
    assert jnp.allclose(loss, ref_loss, rtol=1e-4, atol=1e-5)
    assert jnp.allclose(dist, ref_dist, rtol=1e-4, atol=1e-4)

    # Auto-tiled path (single VMEM-budgeted tile at this N).
    loss2, dist2 = cosine_contrastive_loss(output1, output2, label)
    jax.block_until_ready((loss2, dist2))
    assert jnp.allclose(loss2, ref_loss, rtol=1e-4, atol=1e-5)
    assert jnp.allclose(dist2, ref_dist, rtol=1e-4, atol=1e-4)

    print("KERNEL_OK")
</pallas_src>

<mosaic_0001>
module attributes {stable_mosaic.version = 11 : i64} {
  func.func @_ccl_kernel(%arg0: i32, %arg1: memref<128x128xbf16, #tpu.memory_space<vmem>>, %arg2: memref<128x128xbf16, #tpu.memory_space<vmem>>, %arg3: memref<1x1x128xf32, #tpu.memory_space<vmem>>, %arg4: memref<1x1x128xf32, #tpu.memory_space<vmem>>, %arg5: memref<1x1x128xf32, #tpu.memory_space<vmem>>) attributes {dimension_semantics = [#tpu.dimension_semantics<parallel>], iteration_bounds = array<i64: 2>, scalar_prefetch = 0 : i64, scratch_operands = 0 : i64, tpu.core_type = #tpu.core_type<tc>, window_params = [{transform_indices = @transform_0, window_bounds = array<i64: 128, 128>}, {transform_indices = @transform_1, window_bounds = array<i64: 128, 128>}, {transform_indices = @transform_2, window_bounds = array<i64: 1, 1, 128>}, {transform_indices = @transform_3, window_bounds = array<i64: 1, 1, 128>}, {transform_indices = @transform_4, window_bounds = array<i64: 1, 1, 128>}]} {
    %c0 = arith.constant 0 : index
    %c0_0 = arith.constant 0 : index
    %0 = vector.load %arg1[%c0, %c0_0] : memref<128x128xbf16, #tpu.memory_space<vmem>>, vector<128x128xbf16>
    %1 = arith.extf %0 : vector<128x128xbf16> to vector<128x128xf32>
    %c0_1 = arith.constant 0 : index
    %c0_2 = arith.constant 0 : index
    %2 = vector.load %arg2[%c0_1, %c0_2] : memref<128x128xbf16, #tpu.memory_space<vmem>>, vector<128x128xbf16>
    %3 = arith.extf %2 : vector<128x128xbf16> to vector<128x128xf32>
    %4 = arith.mulf %1, %1 : vector<128x128xf32>
    %cst = arith.constant dense<0.000000e+00> : vector<128xf32>
    %5 = vector.multi_reduction <add>, %4, %cst [1] : vector<128x128xf32> to vector<128xf32>
    %6 = vector.shape_cast %5 : vector<128xf32> to vector<128x1xf32>
    %7 = arith.mulf %3, %3 : vector<128x128xf32>
    %cst_3 = arith.constant dense<0.000000e+00> : vector<128xf32>
    %8 = vector.multi_reduction <add>, %7, %cst_3 [1] : vector<128x128xf32> to vector<128xf32>
    %9 = vector.shape_cast %8 : vector<128xf32> to vector<128x1xf32>
    %10 = arith.mulf %1, %3 : vector<128x128xf32>
    %cst_4 = arith.constant dense<0.000000e+00> : vector<128xf32>
    %11 = vector.multi_reduction <add>, %10, %cst_4 [1] : vector<128x128xf32> to vector<128xf32>
    %12 = vector.shape_cast %11 : vector<128xf32> to vector<128x1xf32>
    %13 = vector.shape_cast %6 : vector<128x1xf32> to vector<1x128xf32>
    %14 = vector.shape_cast %9 : vector<128x1xf32> to vector<1x128xf32>
    %15 = vector.shape_cast %12 : vector<128x1xf32> to vector<1x128xf32>
    %c0_5 = arith.constant 0 : index
    %c0_6 = arith.constant 0 : index
    %c0_7 = arith.constant 0 : index
    %16 = vector.load %arg3[%c0_5, %c0_6, %c0_7] : memref<1x1x128xf32, #tpu.memory_space<vmem>>, vector<1x1x128xf32>
    %17 = vector.shape_cast %16 : vector<1x1x128xf32> to vector<1x128xf32>
    %18 = arith.mulf %13, %14 : vector<1x128xf32>
    %19 = math.rsqrt %18 : vector<1x128xf32>
    %20 = arith.mulf %15, %19 : vector<1x128xf32>
    %cst_8 = arith.constant 1.000000e+00 : f32
    %21 = vector.broadcast %cst_8 : f32 to vector<1x128xf32>
    %22 = arith.subf %21, %20 : vector<1x128xf32>
    %cst_9 = arith.constant 9.99999993E-9 : f32
    %23 = vector.broadcast %cst_9 : f32 to vector<1x128xf32>
    %24 = arith.addf %22, %23 : vector<1x128xf32>
    %cst_10 = arith.constant 1.000000e+01 : f32
    %25 = vector.broadcast %cst_10 : f32 to vector<1x128xf32>
    %26 = arith.mulf %25, %24 : vector<1x128xf32>
    %cst_11 = arith.constant 2.000000e-01 : f32
    %27 = vector.broadcast %cst_11 : f32 to vector<1x128xf32>
    %28 = arith.subf %27, %26 : vector<1x128xf32>
    %cst_12 = arith.constant 0.000000e+00 : f32
    %29 = vector.broadcast %cst_12 : f32 to vector<1x128xf32>
    %30 = arith.maximumf %28, %29 : vector<1x128xf32>
    %cst_13 = arith.constant 1.000000e+00 : f32
    %31 = vector.broadcast %cst_13 : f32 to vector<1x128xf32>
    %32 = arith.subf %31, %17 : vector<1x128xf32>
    %33 = arith.mulf %26, %26 : vector<1x128xf32>
    %34 = arith.mulf %32, %33 : vector<1x128xf32>
    %35 = arith.mulf %30, %30 : vector<1x128xf32>
    %36 = arith.mulf %17, %35 : vector<1x128xf32>
    %37 = arith.addf %34, %36 : vector<1x128xf32>
    %38 = vector.shape_cast %26 : vector<1x128xf32> to vector<1x1x128xf32>
    %c0_14 = arith.constant 0 : index
    %c0_15 = arith.constant 0 : index
    %c0_16 = arith.constant 0 : index
    %39 = vector.load %arg4[%c0_14, %c0_15, %c0_16] : memref<1x1x128xf32, #tpu.memory_space<vmem>>, vector<1x1x128xf32>
    tpu.vector_store %arg4[%c0_14, %c0_15, %c0_16], %38 {strides = array<i32>} : memref<1x1x128xf32, #tpu.memory_space<vmem>>, vector<1x1x128xf32>,
    %40 = vector.shape_cast %37 : vector<1x128xf32> to vector<1x1x128xf32>
    %c0_17 = arith.constant 0 : index
    %c0_18 = arith.constant 0 : index
    %c0_19 = arith.constant 0 : index
    %41 = vector.load %arg5[%c0_17, %c0_18, %c0_19] : memref<1x1x128xf32, #tpu.memory_space<vmem>>, vector<1x1x128xf32>
    tpu.vector_store %arg5[%c0_17, %c0_18, %c0_19], %40 {strides = array<i32>} : memref<1x1x128xf32, #tpu.memory_space<vmem>>, vector<1x1x128xf32>,
    return
  }
  func.func @transform_0(%arg0: i32) -> (i32, i32) {
    %c0_i32 = arith.constant 0 : i32
    %c0_i32_0 = arith.constant 0 : i32
    return %arg0, %c0_i32 : i32, i32
  }
  func.func @transform_1(%arg0: i32) -> (i32, i32) {
    %c0_i32 = arith.constant 0 : i32
    %c0_i32_0 = arith.constant 0 : i32
    return %arg0, %c0_i32 : i32, i32
  }
  func.func @transform_2(%arg0: i32) -> (i32, i32, i32) {
    %c0_i32 = arith.constant 0 : i32
    %c0_i32_0 = arith.constant 0 : i32
    %c0_i32_1 = arith.constant 0 : i32
    return %arg0, %c0_i32, %c0_i32_0 : i32, i32, i32
  }
  func.func @transform_3(%arg0: i32) -> (i32, i32, i32) {
    %c0_i32 = arith.constant 0 : i32
    %c0_i32_0 = arith.constant 0 : i32
    %c0_i32_1 = arith.constant 0 : i32
    return %arg0, %c0_i32, %c0_i32_0 : i32, i32, i32
  }
  func.func @transform_4(%arg0: i32) -> (i32, i32, i32) {
    %c0_i32 = arith.constant 0 : i32
    %c0_i32_0 = arith.constant 0 : i32
    %c0_i32_1 = arith.constant 0 : i32
    return %arg0, %c0_i32, %c0_i32_0 : i32, i32, i32
  }
}

module attributes {stable_mosaic.version = 11 : i64} {
  func.func @_ccl_kernel(%arg0: i32, %arg1: memref<128x128xbf16, #tpu.memory_space<vmem>>, %arg2: memref<128x128xbf16, #tpu.memory_space<vmem>>, %arg3: memref<128x1xf32, #tpu.memory_space<vmem>>, %arg4: memref<128x1xf32, #tpu.memory_space<vmem>>, %arg5: memref<128x1xf32, #tpu.memory_space<vmem>>) attributes {dimension_semantics = [#tpu.dimension_semantics<parallel>], iteration_bounds = array<i64: 2>, scalar_prefetch = 0 : i64, scratch_operands = 0 : i64, tpu.core_type = #tpu.core_type<tc>, window_params = [{transform_indices = @transform_0, window_bounds = array<i64: 128, 128>}, {transform_indices = @transform_1, window_bounds = array<i64: 128, 128>}, {transform_indices = @transform_2, window_bounds = array<i64: 128, 1>}, {transform_indices = @transform_3, window_bounds = array<i64: 128, 1>}, {transform_indices = @transform_4, window_bounds = array<i64: 128, 1>}]} {
    %c0 = arith.constant 0 : index
    %c0_0 = arith.constant 0 : index
    %0 = vector.load %arg1[%c0, %c0_0] : memref<128x128xbf16, #tpu.memory_space<vmem>>, vector<128x128xbf16>
    %1 = arith.extf %0 : vector<128x128xbf16> to vector<128x128xf32>
    %c0_1 = arith.constant 0 : index
    %c0_2 = arith.constant 0 : index
    %2 = vector.load %arg2[%c0_1, %c0_2] : memref<128x128xbf16, #tpu.memory_space<vmem>>, vector<128x128xbf16>
    %3 = arith.extf %2 : vector<128x128xbf16> to vector<128x128xf32>
    %4 = arith.mulf %1, %1 : vector<128x128xf32>
    %cst = arith.constant dense<0.000000e+00> : vector<128xf32>
    %5 = vector.multi_reduction <add>, %4, %cst [1] : vector<128x128xf32> to vector<128xf32>
    %6 = vector.shape_cast %5 : vector<128xf32> to vector<128x1xf32>
    %7 = arith.mulf %3, %3 : vector<128x128xf32>
    %cst_3 = arith.constant dense<0.000000e+00> : vector<128xf32>
    %8 = vector.multi_reduction <add>, %7, %cst_3 [1] : vector<128x128xf32> to vector<128xf32>
    %9 = vector.shape_cast %8 : vector<128xf32> to vector<128x1xf32>
    %10 = arith.mulf %1, %3 : vector<128x128xf32>
    %cst_4 = arith.constant dense<0.000000e+00> : vector<128xf32>
    %11 = vector.multi_reduction <add>, %10, %cst_4 [1] : vector<128x128xf32> to vector<128xf32>
    %12 = vector.shape_cast %11 : vector<128xf32> to vector<128x1xf32>
    %c0_5 = arith.constant 0 : index
    %c0_6 = arith.constant 0 : index
    %13 = vector.load %arg3[%c0_5, %c0_6] : memref<128x1xf32, #tpu.memory_space<vmem>>, vector<128x1xf32>
    %14 = arith.mulf %6, %9 : vector<128x1xf32>
    %15 = math.rsqrt %14 : vector<128x1xf32>
    %16 = arith.mulf %12, %15 : vector<128x1xf32>
    %cst_7 = arith.constant 1.000000e+00 : f32
    %17 = vector.broadcast %cst_7 : f32 to vector<128x1xf32>
    %18 = arith.subf %17, %16 : vector<128x1xf32>
    %cst_8 = arith.constant 9.99999993E-9 : f32
    %19 = vector.broadcast %cst_8 : f32 to vector<128x1xf32>
    %20 = arith.addf %18, %19 : vector<128x1xf32>
    %cst_9 = arith.constant 1.000000e+01 : f32
    %21 = vector.broadcast %cst_9 : f32 to vector<128x1xf32>
    %22 = arith.mulf %21, %20 : vector<128x1xf32>
    %cst_10 = arith.constant 2.000000e-01 : f32
    %23 = vector.broadcast %cst_10 : f32 to vector<128x1xf32>
    %24 = arith.subf %23, %22 : vector<128x1xf32>
    %cst_11 = arith.constant 0.000000e+00 : f32
    %25 = vector.broadcast %cst_11 : f32 to vector<128x1xf32>
    %26 = arith.maximumf %24, %25 : vector<128x1xf32>
    %cst_12 = arith.constant 1.000000e+00 : f32
    %27 = vector.broadcast %cst_12 : f32 to vector<128x1xf32>
    %28 = arith.subf %27, %13 : vector<128x1xf32>
    %29 = arith.mulf %22, %22 : vector<128x1xf32>
    %30 = arith.mulf %28, %29 : vector<128x1xf32>
    %31 = arith.mulf %26, %26 : vector<128x1xf32>
    %32 = arith.mulf %13, %31 : vector<128x1xf32>
    %33 = arith.addf %30, %32 : vector<128x1xf32>
    %c0_13 = arith.constant 0 : index
    %c0_14 = arith.constant 0 : index
    %34 = vector.load %arg4[%c0_13, %c0_14] : memref<128x1xf32, #tpu.memory_space<vmem>>, vector<128x1xf32>
    tpu.vector_store %arg4[%c0_13, %c0_14], %22 {strides = array<i32>} : memref<128x1xf32, #tpu.memory_space<vmem>>, vector<128x1xf32>,
    %c0_15 = arith.constant 0 : index
    %c0_16 = arith.constant 0 : index
    %35 = vector.load %arg5[%c0_15, %c0_16] : memref<128x1xf32, #tpu.memory_space<vmem>>, vector<128x1xf32>
    tpu.vector_store %arg5[%c0_15, %c0_16], %33 {strides = array<i32>} : memref<128x1xf32, #tpu.memory_space<vmem>>, vector<128x1xf32>,
    return
  }
  func.func @transform_0(%arg0: i32) -> (i32, i32) {
    %c0_i32 = arith.constant 0 : i32
    %c0_i32_0 = arith.constant 0 : i32
    return %arg0, %c0_i32 : i32, i32
  }
  func.func @transform_1(%arg0: i32) -> (i32, i32) {
    %c0_i32 = arith.constant 0 : i32
    %c0_i32_0 = arith.constant 0 : i32
    return %arg0, %c0_i32 : i32, i32
  }
  func.func @transform_2(%arg0: i32) -> (i32, i32) {
    %c0_i32 = arith.constant 0 : i32
    %c0_i32_0 = arith.constant 0 : i32
    return %arg0, %c0_i32 : i32, i32
  }
  func.func @transform_3(%arg0: i32) -> (i32, i32) {
    %c0_i32 = arith.constant 0 : i32
    %c0_i32_0 = arith.constant 0 : i32
    return %arg0, %c0_i32 : i32, i32
  }
  func.func @transform_4(%arg0: i32) -> (i32, i32) {
    %c0_i32 = arith.constant 0 : i32
    %c0_i32_0 = arith.constant 0 : i32
    return %arg0, %c0_i32 : i32, i32
  }
}

</mosaic_0001>

<bundles_post_ra>
// kernel: tpu_custom_call.1
= control target key start
LH: loop header
LB: loop body
LE: loop exit
PB: predicated region body
PF: predicated region fallthrough
CT: control target
= control target key end

     0   :  { %10 = vsyncpa [#allocation3], 0  ;;  %s5686_s0 = inlined_call_operand.hbm [shape: bf16[200,128], index: 0, kind: input, shape index: {}]   ;;  %s5687_s1 = inlined_call_operand.hbm [shape: bf16[200,128], index: 1, kind: input, shape index: {}]   ;;  %s5688_s2 = inlined_call_operand.vmem [shape: f32[2,1,128], index: 2, kind: input, shape index: {}]   ;;  %s5689_s3 = inlined_call_operand.hbm [shape: f32[2,1,128], index: 3, kind: output, shape index: {0}]   ;;  %s5690_s4 = inlined_call_operand.hbm [shape: f32[2,1,128], index: 4, kind: output, shape index: {1}]  }
   0x1   :  { %12 = vsyncpa [#allocation3 + $0x1], 0 }
   0x2   :  { %13 = vsyncpa [#allocation6], 0 }
   0x3   :  { %15 = vsyncpa [#allocation6 + $0x1], 0 }
   0x4   :  { %16 = vsyncpa [#allocation4], 0 }
   0x5   :  { %18 = vsyncpa [#allocation4 + $0x1], 0 }
   0x6   :  { %19 = vsyncpa [#allocation9], 0 }
   0x7   :  { %21 = vsyncpa [#allocation9 + $0x1], 0  ;;  %s4253_s15 = smov 0   ;;  %s4255_s16 = smov 0  }
   0x8   :  { %s4257_s17 = smov 0   ;;  %s4259_s18 = smov 0  }
   0x9 LB: > { %s4274_s19 = sadd.s32 4294967295, %s4216_s18   ;;  %s3868_s20 = sadd.s32 4294967294, %s4216_s18   ;;  %s4216_s18 = sphi %s4259_s18, %s5741_s18   ;;  %s4212_s17 = sphi %s4257_s17, %s5740_s17   ;;  %s4208_s16 = sphi %s4255_s16, %s5739_s16   ;;  %s4204_s15 = sphi %s4253_s15, %s5738_s15  }
   0xa   : > { %s4278_s21 = sadd.s32 1, %s4216_s18   ;;  %s34_s22 = sadd.s32 1, %s4212_s17 }
   0xb   : > { %s31_s23 = ssub.s32 %s4216_s18, %s4278_s21  ;;  %p41_p0 = scmp.ne.s32.totalorder %s4212_s17, %s4208_s16 }
   0xc   : > { %p32_p1 = scmp.eq.s32.totalorder %s31_s23, 0  ;;  %p42_p2 = scmp.eq.s32.totalorder %s4216_s18, 0 }
   0xd   : > { %p47_p3 = scmp.ne.s32.totalorder %s4208_s16, %s4204_s15  ;;  %p48_p4 = scmp.eq.s32.totalorder %s4274_s19, 0 }
   0xe   : > { %s4290_s24 = scalar_select %p32_p1, %s4212_s17, %s34_s22  }
   0xf   : > { %p4292_p5 = por %p42_p2, %p41_p0  ;;  %p4296_p6 = por %p48_p4, %p47_p3 }
  0x10   : > { %p123_p7 = scmp.eq.s32.totalorder %s4274_s19, 1  ;;  %p129_p8 = scmp.eq.s32.totalorder %s3868_s20, 1 }
  0x11   : > { %p5691_p11 = scmp.ge.s32.totalorder %s4216_s18, 2 }
  0x12   : > { %p4301_p9 = por %p123_p7, %p41_p0  ;;  %p4305_p10 = por %p129_p8, %p47_p3 }
  0x13   : > { %171 = sbr.rel (%p5691_p11) target bundleno = 96 (0x60), region = 16 }
  0x14   : > { %s5708_s27 = scalar_select %p4301_p9, 1, 0 }
  0x15   : > { %s5709_s28 = scalar_select %p4305_p10, 1, 0 }
  0x1a   : > { %174 = sbr.rel (!%p4292_p5) target bundleno = 61 (0x3d), region = 20  ;;  %s175_s29 = sand.u32 (%p4292_p5), 1, %s4212_s17  }
  0x1b   : > { %s3872_s30 = sshll.u32 (%p4292_p5), %s4216_s18, 4  ;;  %s3871_s5 = sshll.u32 (%p4292_p5), %s175_s29, 6 }
  0x1c   : > { %s181_s6 = ssub.s32 (%p4292_p5), 25, %s3872_s30  ;;  %s4319_s9 = scalar_lea.sflag (%p4292_p5), [#allocation3], %s175_s29 }
  0x1d   : > { %p182_p12 = scmp.lt.s32.totalorder (%p4292_p5), %s181_s6, 16  ;;  %s179_s10 = scalar_lea.vmem (%p4292_p5), [#allocation2], %s3871_s5 }
  0x21   : > { %s5743_s6 = smov (!%p182_p12, %s181_s6), 16 }
  0x22   : > { %s4316_s7 = sshll.u32 %s5743_s6, 6 }
  0x23   : > { %s186_s8 = ssub.s32 1024, %s4316_s7 }
  0x24   : > { %187 = vsyncadd %s4319_s9, %s186_s8  ;;  %p3874_p13 = scmp.ne.s32.totalorder %s4316_s7, 0  ;;  %s3892_s11 = sshll.u32 %s4216_s18, 10 }
  0x25   : > { %s4327_s14 = scalar_lea.hbm %s5686_s0, %s3892_s11  ;;  %s192_s20 = sshll.u32 %s179_s10, 4  ;;  %s4329_s20 = int_to_ptr.vmem [resolvable:$true] %s192_s20 }
  0x26   : > { %s4058_s22 = scalar_lea.hbm %s4327_s14, %s4316_s7  ;;  %s4062_s30 = scalar_lea.hbm %s5686_s0, 1600 }
  0x27   : > { %p4059_p0 = scmp.ne.s32.totalorder %s4327_s14, %s4058_s22  ;;  %p4063_p3 = scmp.lt.u32.totalorder %s4327_s14, %s5686_s0 }
  0x28   : > { %p4064_p4 = scmp.lt.u32.totalorder %s4062_s30, %s4058_s22  ;;  %p4066_p8 = scmp.lt.u32.totalorder %s4058_s22, %s4327_s14 }
  0x29   : > { %p4060_p1 = pnand %p4059_p0, %p3874_p13 }
  0x2a   : > { %p4065_p7 = por %p4064_p4, %p4063_p3 }
  0x2b   : > { %p4061_p2 = pneg %p4060_p1 }
  0x2c   : > { %p4067_p12 = por %p4066_p8, %p4065_p7 }
  0x2e   : > { %p4068_p11 = pnand %p4067_p12, %p4061_p2 }
  0x30   : > { %4071 = shalt.err (!%p4068_p11)
}
  0x31   : > { %s4072_s8 = scalar_lea.vmem %s4329_s20, %s4316_s7  ;;  %s4218_s10 = smov [#allocation2]  }
  0x32   : > { %p4073_p0 = scmp.ne.s32.totalorder %s4329_s20, %s4072_s8  ;;  %s4076_s11 = sshll.u32 %s4218_s10, 4  ;;  %s4077_s11 = int_to_ptr.vmem [resolvable:$false] %s4076_s11 }
  0x33   : > { %s4078_s12 = scalar_lea.vmem %s4077_s11, 2048  ;;  %p4079_p9 = scmp.lt.s32.totalorder %s4329_s20, %s4077_s11 }
  0x34   : > { %p4074_p1 = pnand %p4073_p0, %p3874_p13  ;;  %p4080_p3 = scmp.lt.s32.totalorder %s4078_s12, %s4072_s8 }
  0x36   : > { %p4075_p10 = pneg %p4074_p1  ;;  %p4081_p4 = por %p4080_p3, %p4079_p9 }
  0x38   : > { %p4082_p7 = pnand %p4081_p4, %p4075_p10 }
  0x3a   : > { %4085 = shalt.err (!%p4082_p7)
}
  0x3b   : > { %s4219_s13 = smov 64   ;;  %s4220_s22 = smov 4  }
  0x3c   : > { %198 = dma.hbm_to_vmem [thread:$0]  (%p3874_p13), %s4327_s14, %s4316_s7, %s4329_s20, %s4319_s9, %s4219_s13, %s4219_s13, %s4220_s22  }
  0x3d PF: > { %201 = sbr.rel (!%p4292_p5) target bundleno = 96 (0x60), region = 24  ;;  %s202_s23 = sand.u32 (%p4292_p5), 1, %s4212_s17  }
  0x3e   : > { %s3879_s29 = sshll.u32 (%p4292_p5), %s4216_s18, 4  ;;  %s3878_s30 = sshll.u32 (%p4292_p5), %s202_s23, 6 }
  0x3f   : > { %s208_s5 = ssub.s32 (%p4292_p5), 25, %s3879_s29  ;;  %s4363_s10 = scalar_lea.sflag (%p4292_p5), [#allocation6], %s202_s23 }
  0x40   : > { %p209_p9 = scmp.lt.s32.totalorder (%p4292_p5), %s208_s5, 16  ;;  %s206_s7 = scalar_lea.vmem (%p4292_p5), [#allocation5], %s3878_s30 }
  0x44   : > { %s5745_s5 = smov (!%p209_p9, %s208_s5), 16 }
  0x45   : > { %s4360_s6 = sshll.u32 %s5745_s5, 6 }
  0x46   : > { %s213_s8 = ssub.s32 1024, %s4360_s6 }
  0x47   : > { %214 = vsyncadd %s4363_s10, %s213_s8  ;;  %p3881_p5 = scmp.ne.s32.totalorder %s4360_s6, 0  ;;  %s3893_s25 = sshll.u32 %s4216_s18, 10 }
  0x48   : > { %s4371_s20 = scalar_lea.hbm %s5687_s1, %s3893_s25  ;;  %s219_s11 = sshll.u32 %s206_s7, 4  ;;  %s4373_s11 = int_to_ptr.vmem [resolvable:$true] %s219_s11 }
  0x49   : > { %s4086_s12 = scalar_lea.hbm %s4371_s20, %s4360_s6  ;;  %s4090_s23 = scalar_lea.hbm %s5687_s1, 1600 }
  0x4a   : > { %p4087_p10 = scmp.ne.s32.totalorder %s4371_s20, %s4086_s12  ;;  %p4091_p2 = scmp.lt.u32.totalorder %s4371_s20, %s5687_s1 }
  0x4b   : > { %p4092_p8 = scmp.lt.u32.totalorder %s4090_s23, %s4086_s12  ;;  %p4094_p0 = scmp.lt.u32.totalorder %s4086_s12, %s4371_s20 }
  0x4c   : > { %p4088_p11 = pnand %p4087_p10, %p3881_p5 }
  0x4d   : > { %p4093_p12 = por %p4092_p8, %p4091_p2 }
  0x4e   : > { %p4089_p13 = pneg %p4088_p11 }
  0x4f   : > { %p4095_p1 = por %p4094_p0, %p4093_p12 }
  0x51   : > { %p4096_p3 = pnand %p4095_p1, %p4089_p13 }
  0x53   : > { %4099 = shalt.err (!%p4096_p3)
}
  0x54   : > { %s4100_s5 = scalar_lea.vmem %s4373_s11, %s4360_s6  ;;  %s4221_s8 = smov [#allocation5]  }
  0x55   : > { %p4101_p4 = scmp.ne.s32.totalorder %s4373_s11, %s4100_s5  ;;  %s4104_s7 = sshll.u32 %s4221_s8, 4  ;;  %s4105_s7 = int_to_ptr.vmem [resolvable:$false] %s4104_s7 }
  0x56   : > { %s4106_s25 = scalar_lea.vmem %s4105_s7, 2048  ;;  %p4107_p10 = scmp.lt.s32.totalorder %s4373_s11, %s4105_s7 }
  0x57   : > { %p4102_p7 = pnand %p4101_p4, %p3881_p5  ;;  %p4108_p11 = scmp.lt.s32.totalorder %s4106_s25, %s4100_s5 }
  0x59   : > { %p4103_p9 = pneg %p4102_p7  ;;  %p4109_p2 = por %p4108_p11, %p4107_p10 }
  0x5b   : > { %p4110_p8 = pnand %p4109_p2, %p4103_p9 }
  0x5d   : > { %4113 = shalt.err (!%p4110_p8)
}
  0x5e   : > { %s4222_s9 = smov 64   ;;  %s4223_s14 = smov 4  }
  0x5f   : > { %225 = dma.hbm_to_vmem [thread:$0]  (%p3881_p5), %s4371_s20, %s4360_s6, %s4373_s11, %s4363_s10, %s4222_s9, %s4222_s9, %s4223_s14  }
  0x60 PF: > { %p3885_p13 = scmp.ge.s32.totalorder %s4216_s18, 1  ;;  %p233_p12 = scmp.lt.s32.totalorder %s4216_s18, 3 }
  0x62   : > { %p234_p0 = pnand %p3885_p13, %p233_p12 }
  0x64   : > { %237 = sbr.rel (%p234_p0) target bundleno = 688 (0x2b0), region = 32 }
  0x6b   : > { %s4403_s12 = sand.u32 1, %s4208_s16  }
  0x6c   : > { %s3886_s13 = sshll.u32 %s4403_s12, 6  ;;  %s240_s22 = scalar_lea.sflag [#allocation3], %s4403_s12 }
  0x6d   : > { %s4407_s23 = scalar_lea.vmem [#allocation2], %s3886_s13 }
  0x6e   : > { %4187 = dma.done.wait (%p4296_p6), %s240_s22, 1024  }
  0x6f   : > { %4189 = vsyncadd (%p4296_p6), %s240_s22, 4294966272  ;;  %s249_s6 = scalar_lea.sflag [#allocation6], %s4403_s12  ;;  %s4414_s10 = scalar_lea.vmem [#allocation5], %s3886_s13 }
  0x70   : > { %4191 = dma.done.wait (%p4296_p6), %s249_s6, 1024  }
  0x71   : > { %4193 = vsyncadd (%p4296_p6), %s249_s6, 4294966272  ;;  %v3958_v0 = vld [vmem:[%s4407_s23 + $0x8] sm:$0xff]   ;;  %v3895_v1 = vld [vmem:[%s4407_s23] sm:$0xff]   ;;  %vm2026_vm0 = vcmask 130112   ;;  %vm2033_vm1 = vcmask 195712   ;;  %vm2040_vm2 = vcmask 261312  }
  0x72   : > { %v4422_v2 = vunpack.c.l.bf16 %v3958_v0  ;;  %v4424_v3 = vunpack.c.l.bf16 %v3895_v1  ;;  %v4426_v4 = vunpack.c.h.bf16 %v3958_v0  ;;  %v4428_v5 = vunpack.c.h.bf16 %v3895_v1  ;;  %v3959_v6 = vld [vmem:[%s4407_s23 + $0x10] sm:$0xff]   ;;  %v3960_v13 = vld [vmem:[%s4407_s23 + $0x18] sm:$0xff]   ;;  %v3961_v18 = vld [vmem:[%s4407_s23 + $0x20] sm:$0xff]   ;;  %s3888_s26 = sshll.u32 %s4274_s19, 4  ;;  %s281_s20 = scalar_lea.vmem [#allocation7], %s4403_s12 }
  0x73   : > { %v4439_v11 = vunpack.c.h.bf16 %v3959_v6  ;;  %v4441_v12 = vunpack.c.l.bf16 %v3959_v6  ;;  %v4448_v16 = vunpack.c.h.bf16 %v3960_v13  ;;  %v4450_v17 = vunpack.c.l.bf16 %v3960_v13  ;;  %v3962_v23 = vld [vmem:[%s4407_s23 + $0x28] sm:$0xff]   ;;  %v3963_v28 = vld [vmem:[%s4407_s23 + $0x30] sm:$0xff]   ;;  %v3964_v33 = vld [vmem:[%s4407_s23 + $0x38] sm:$0xff]   ;;  %s3729_s11 = sshll.u32 %s281_s20, 4  ;;  %s5551_s5 = scalar_lea.hbm %s5689_s3, %s3888_s26  ;;  %s5553_s11 = int_to_ptr.vmem [resolvable:$true] %s3729_s11 }
  0x74   : > { %v367_v7 = vmul.f32 %v4422_v2, %v4422_v2  ;;  %v365_v8 = vmul.f32 %v4424_v3, %v4424_v3  ;;  %v368_v9 = vmul.f32 %v4426_v4, %v4426_v4  ;;  %v366_v10 = vmul.f32 %v4428_v5, %v4428_v5  ;;  %v3927_v38 = vld [vmem:[%s4414_s10] sm:$0xff]   ;;  %v3965_v43 = vld [vmem:[%s4414_s10 + $0x8] sm:$0xff]   ;;  %v3966_v48 = vld [vmem:[%s4414_s10 + $0x10] sm:$0xff]   ;;  %s3713_s8 = scalar_lea.sflag [#allocation4], %s4403_s12  ;;  %s4114_s7 = scalar_lea.vmem %s5553_s11, 16 }
  0x75   : > { %v370_v14 = vmul.f32 %v4439_v11, %v4439_v11  ;;  %v369_v15 = vmul.f32 %v4441_v12, %v4441_v12  ;;  %v372_v19 = vmul.f32 %v4448_v16, %v4448_v16  ;;  %v371_v20 = vmul.f32 %v4450_v17, %v4450_v17  ;;  %v3967_v53 = vld [vmem:[%s4414_s10 + $0x18] sm:$0xff]   ;;  %v3968_v58 = vld [vmem:[%s4414_s10 + $0x20] sm:$0xff]   ;;  %v3969_v63 = vld [vmem:[%s4414_s10 + $0x28] sm:$0xff]   ;;  %p4115_p6 = scmp.ne.s32.totalorder %s5553_s11, %s4114_s7  ;;  %p5735_p5 = scmp.ne.s32.totalorder %s5708_s27, 0 }
  0x76   : > { %385 = vadd.xlane.f32.xlu1 %v367_v7  ;;  %381 = vadd.xlane.f32.xlu0 %v365_v8  ;;  %v4457_v21 = vunpack.c.h.bf16 %v3961_v18  ;;  %v4459_v22 = vunpack.c.l.bf16 %v3961_v18  ;;  %v4466_v26 = vunpack.c.h.bf16 %v3962_v23  ;;  %v4468_v27 = vunpack.c.l.bf16 %v3962_v23  ;;  %v3970_v8 = vld [vmem:[%s4414_s10 + $0x30] sm:$0xff]   ;;  %s4226_s25 = smov [#allocation7]  }
  0x77   : > { %v4475_v31 = vunpack.c.h.bf16 %v3963_v28  ;;  %v4477_v32 = vunpack.c.l.bf16 %v3963_v28  ;;  %v4484_v36 = vunpack.c.h.bf16 %v3964_v33  ;;  %v4486_v37 = vunpack.c.l.bf16 %v3964_v33  ;;  %p4116_p1 = pnand %p4115_p6, %p5735_p5  ;;  %s4118_s9 = sshll.u32 %s4226_s25, 4  ;;  %s4119_s9 = int_to_ptr.vmem [resolvable:$false] %s4118_s9 }
  0x78   : > { %v374_v24 = vmul.f32 %v4457_v21, %v4457_v21  ;;  %v373_v25 = vmul.f32 %v4459_v22, %v4459_v22  ;;  %v376_v29 = vmul.f32 %v4466_v26, %v4466_v26  ;;  %v375_v30 = vmul.f32 %v4468_v27, %v4468_v27  ;;  %s4120_s14 = scalar_lea.vmem %s4119_s9, 32  ;;  %p4121_p4 = scmp.lt.s32.totalorder %s5553_s11, %s4119_s9 }
  0x79   : > { %v378_v34 = vmul.f32 %v4475_v31, %v4475_v31  ;;  %v377_v35 = vmul.f32 %v4477_v32, %v4477_v32  ;;  %v380_v39 = vmul.f32 %v4484_v36, %v4484_v36  ;;  %v379_v40 = vmul.f32 %v4486_v37, %v4486_v37  ;;  %p4117_p3 = pneg %p4116_p1  ;;  %p4122_p7 = scmp.lt.s32.totalorder %s4120_s14, %s4114_s7 }
  0x7a   : > { %387 = vadd.xlane.f32.xlu1 %v368_v9  ;;  %383 = vadd.xlane.f32.xlu0 %v366_v10  ;;  %v3929_v41 = vunpack.c.h.bf16 %v3927_v38  ;;  %v3928_v42 = vunpack.c.l.bf16 %v3927_v38  ;;  %v3933_v46 = vunpack.c.h.bf16 %v3965_v43  ;;  %v3932_v47 = vunpack.c.l.bf16 %v3965_v43 }
  0x7b   : > { %v3937_v51 = vunpack.c.h.bf16 %v3966_v48  ;;  %v3936_v52 = vunpack.c.l.bf16 %v3966_v48  ;;  %v3941_v56 = vunpack.c.h.bf16 %v3967_v53  ;;  %v3940_v57 = vunpack.c.l.bf16 %v3967_v53  ;;  %p4123_p9 = por %p4122_p7, %p4121_p4 }
  0x7c   : > { %v414_v44 = vmul.f32 %v3929_v41, %v3929_v41  ;;  %v413_v45 = vmul.f32 %v3928_v42, %v3928_v42  ;;  %v416_v49 = vmul.f32 %v3933_v46, %v3933_v46  ;;  %v415_v50 = vmul.f32 %v3932_v47, %v3932_v47 }
  0x7d   : > { %v418_v54 = vmul.f32 %v3937_v51, %v3937_v51  ;;  %v417_v55 = vmul.f32 %v3936_v52, %v3936_v52  ;;  %v420_v59 = vmul.f32 %v3941_v56, %v3941_v56  ;;  %v419_v60 = vmul.f32 %v3940_v57, %v3940_v57  ;;  %p4124_p10 = pnand %p4123_p9, %p4117_p3 }
  0x7e   : > { %391 = vadd.xlane.f32.xlu1 %v370_v14  ;;  %389 = vadd.xlane.f32.xlu0 %v369_v15  ;;  %v3945_v61 = vunpack.c.h.bf16 %v3968_v58  ;;  %v3944_v62 = vunpack.c.l.bf16 %v3968_v58  ;;  %v3949_v6 = vunpack.c.h.bf16 %v3969_v63  ;;  %v3948_v7 = vunpack.c.l.bf16 %v3969_v63  ;;  %v3971_v15 = vld [vmem:[%s4414_s10 + $0x38] sm:$0xff]  }
  0x7f   : > { %v3953_v13 = vunpack.c.h.bf16 %v3970_v8  ;;  %v3952_v14 = vunpack.c.l.bf16 %v3970_v8  ;;  %v461_v23 = vmul.f32 %v3928_v42, %v4424_v3  ;;  %v463_v33 = vmul.f32 %v3932_v47, %v4422_v2 }
  0x80   : > { %v422_v0 = vmul.f32 %v3945_v61, %v3945_v61  ;;  %v421_v1 = vmul.f32 %v3944_v62, %v3944_v62  ;;  %v424_v9 = vmul.f32 %v3949_v6, %v3949_v6  ;;  %v423_v10 = vmul.f32 %v3948_v7, %v3948_v7 }
  0x81   : > { %v426_v18 = vmul.f32 %v3953_v13, %v3953_v13  ;;  %v468_v3 = vmul.f32 %v3941_v56, %v4448_v16  ;;  %v467_v38 = vmul.f32 %v3940_v57, %v4450_v17  ;;  %v472_v2 = vmul.f32 %v3949_v6, %v4466_v26 }
  0x82   : > { %395 = vadd.xlane.f32.xlu1 %v372_v19  ;;  %393 = vadd.xlane.f32.xlu0 %v371_v20  ;;  %v425_v19 = vmul.f32 %v3952_v14, %v3952_v14  ;;  %v3956_v20 = vunpack.c.l.bf16 %v3971_v15  ;;  %v473_v16 = vmul.f32 %v3952_v14, %v4477_v32  ;;  %vm2047_vm3 = vcmask 326912  }
  0x83   : > { %vm2054_vm4 = vcmask 392512   ;;  %vm2061_vm5 = vcmask 458112   ;;  %vm2068_vm6 = vcmask 523712   ;;  %vm2075_vm7 = vcmask 589312  }
  0x84   : > { %vm2082_vm8 = vcmask 654912   ;;  %vm2089_vm9 = vcmask 720512   ;;  %vm2096_vm10 = vcmask 786112   ;;  %vm2103_vm11 = vcmask 851712  }
  0x85   : > { %vm2110_vm12 = vcmask 917312   ;;  %vm2117_vm13 = vcmask 982912   ;;  %vm2124_vm14 = vcmask 1048512  }
  0x86   : > { %399 = vadd.xlane.f32.xlu1 %v374_v24  ;;  %397 = vadd.xlane.f32.xlu0 %v373_v25  ;;  %v427_v24 = vmul.f32 %v3956_v20, %v3956_v20  ;;  %v3957_v25 = vunpack.c.h.bf16 %v3971_v15 }
  0x88   : > { %v428_v28 = vmul.f32 %v3957_v25, %v3957_v25  ;;  %v476_v17 = vmul.f32 %v3957_v25, %v4484_v36 }
  0x8a   : > { %403 = vadd.xlane.f32.xlu1 %v376_v29  ;;  %401 = vadd.xlane.f32.xlu0 %v375_v30  ;;  %v462_v29 = vmul.f32 %v3929_v41, %v4428_v5  ;;  %v464_v30 = vmul.f32 %v3933_v46, %v4426_v4  ;;  %v470_v5 = vmul.f32 %v3945_v61, %v4457_v21 }
  0x8b   : > { %v469_v4 = vmul.f32 %v3944_v62, %v4459_v22  ;;  %v475_v21 = vmul.f32 %v3956_v20, %v4486_v37  ;;  %v4224_v22 = vmov 0  }
  0x8c   : > { %4024 = vset.pattern.permute.xlu0 %v4224_v22  ;;  %4025 = vset.pattern.permute.xlu1 %v4224_v22 }
  0x8e   : > { %407 = vadd.xlane.f32.xlu1 %v378_v34  ;;  %405 = vadd.xlane.f32.xlu0 %v377_v35  ;;  %v466_v34 = vmul.f32 %v3937_v51, %v4439_v11  ;;  %v465_v35 = vmul.f32 %v3936_v52, %v4441_v12  ;;  %v471_v11 = vmul.f32 %v3948_v7, %v4468_v27 }
  0x8f   : > { %v474_v12 = vmul.f32 %v3953_v13, %v4475_v31 }
  0x92   : > { %411 = vadd.xlane.f32.xlu1 %v380_v39  ;;  %409 = vadd.xlane.f32.xlu0 %v379_v40 }
  0x96   : > { %431 = vadd.xlane.f32.xlu1 %v414_v44  ;;  %429 = vadd.xlane.f32.xlu0 %v413_v45 }
  0x9a   : > { %435 = vadd.xlane.f32.xlu1 %v416_v49  ;;  %433 = vadd.xlane.f32.xlu0 %v415_v50 }
  0x9e   : > { %439 = vadd.xlane.f32.xlu1 %v418_v54  ;;  %437 = vadd.xlane.f32.xlu0 %v417_v55 }
  0xa2   : > { %443 = vadd.xlane.f32.xlu1 %v420_v59  ;;  %441 = vadd.xlane.f32.xlu0 %v419_v60 }
  0xa6   : > { %447 = vadd.xlane.f32.xlu1 %v422_v0  ;;  %445 = vadd.xlane.f32.xlu0 %v421_v1 }
  0xaa   : > { %451 = vadd.xlane.f32.xlu1 %v424_v9  ;;  %449 = vadd.xlane.f32.xlu0 %v423_v10 }
  0xae   : > { %455 = vadd.xlane.f32.xlu1 %v426_v18  ;;  %453 = vadd.xlane.f32.xlu0 %v425_v19 }
  0xb2   : > { %477 = vadd.xlane.f32.xlu1 %v461_v23  ;;  %457 = vadd.xlane.f32.xlu0 %v427_v24  ;;  %v5693_v23 = vlaneseq }
  0xb6   : > { %459 = vadd.xlane.f32.xlu1 %v428_v28  ;;  %479 = vadd.xlane.f32.xlu0 %v462_v29 }
  0xba   : > { %483 = vadd.xlane.f32.xlu1 %v464_v30  ;;  %481 = vadd.xlane.f32.xlu0 %v463_v33  ;;  %v4517_v33 = vshrl.u32 %v5693_v23, 7 }
  0xbc   : > { %v4526_v22 = vsub.s32 2, %v4517_v33 }
  0xbe   : > { %487 = vadd.xlane.f32.xlu1 %v466_v34  ;;  %485 = vadd.xlane.f32.xlu0 %v465_v35  ;;  %v4225_v34 = vmov 1966171168  }
  0xbf   : > { %v1188_v35 = vunpack.c.l.s4 %v4225_v34 }
  0xc2   : > { %491 = vadd.xlane.f32.xlu1 %v468_v3  ;;  %489 = vadd.xlane.f32.xlu0 %v467_v38 }
  0xc6   : > { %495 = vadd.xlane.f32.xlu1 %v470_v5  ;;  %493 = vadd.xlane.f32.xlu0 %v469_v4 }
  0xca   : > { %499 = vadd.xlane.f32.xlu1 %v472_v2  ;;  %497 = vadd.xlane.f32.xlu0 %v471_v11  ;;  %v4520_v2 = vsub.s32 0, %v4517_v33 }
  0xce   : > { %503 = vadd.xlane.f32.xlu1 %v474_v12  ;;  %501 = vadd.xlane.f32.xlu0 %v473_v16 }
  0xd2   : > { %507 = vadd.xlane.f32.xlu1 %v476_v17  ;;  %505 = vadd.xlane.f32.xlu0 %v475_v21  ;;  %v4523_v21 = vsub.s32 1, %v4517_v33 }
 0x103   : > { %v386_v26 = vpop.xlane.xlu1 %385  ;;  %v382_v39 = vpop.xlane.xlu0 %381 }
 0x107   : > { %v388_v27 = vpop.xlane.xlu1 %387  ;;  %v384_v40 = vpop.xlane.xlu0 %383 }
 0x10b   : > { %v392_v41 = vpop.xlane.xlu1 %391  ;;  %v390_v42 = vpop.xlane.xlu0 %389 }
 0x10f   : > { %v396_v31 = vpop.xlane.xlu1 %395  ;;  %v394_v43 = vpop.xlane.xlu0 %393 }
 0x113   : > { %v400_v32 = vpop.xlane.xlu1 %399  ;;  %v398_v44 = vpop.xlane.xlu0 %397 }
 0x117   : > { %v404_v45 = vpop.xlane.xlu1 %403  ;;  %v402_v46 = vpop.xlane.xlu0 %401 }
 0x11b   : > { %v408_v36 = vpop.xlane.xlu1 %407  ;;  %v406_v47 = vpop.xlane.xlu0 %405 }
 0x11f   : > { %v412_v37 = vpop.xlane.xlu1 %411  ;;  %v410_v48 = vpop.xlane.xlu0 %409 }
 0x123   : > { %v432_v49 = vpop.xlane.xlu1 %431  ;;  %v430_v50 = vpop.xlane.xlu0 %429 }
 0x124   : > { %v510_v58 = vmul.f32 %v430_v50, %v382_v39  ;;  %v511_v62 = vmul.f32 %v432_v49, %v384_v40 }
 0x126   : > { %4026 = vrsqrt.f32 %v510_v58 }
 0x127   : > { %v436_v51 = vpop.xlane.xlu1 %435  ;;  %v434_v52 = vpop.xlane.xlu0 %433  ;;  %4028 = vrsqrt.f32 %v511_v62 }
 0x128   : > { %v513_v63 = vmul.f32 %v436_v51, %v388_v27  ;;  %v512_v6 = vmul.f32 %v434_v52, %v386_v26  ;;  %v1189_v26 = vunpack.c.0.s8 %v1188_v35  ;;  %v4548_v51 = vsub.s32 7, %v4517_v33 }
 0x12a   : > { %4030 = vrsqrt.f32 %v513_v63  ;;  %v4551_v52 = vsub.s32 %v1189_v26, %v4517_v33 }
 0x12b   : > { %v440_v53 = vpop.xlane.xlu1 %439  ;;  %v438_v54 = vpop.xlane.xlu0 %437  ;;  %4032 = vrsqrt.f32 %v512_v6 }
 0x12c   : > { %v515_v9 = vmul.f32 %v440_v53, %v392_v41  ;;  %v514_v10 = vmul.f32 %v438_v54, %v390_v42  ;;  %v4531_v41 = vsub.s32 3, %v4517_v33 }
 0x12e   : > { %4034 = vrsqrt.f32 %v515_v9 }
 0x12f   : > { %v444_v55 = vpop.xlane.xlu1 %443  ;;  %v442_v56 = vpop.xlane.xlu0 %441  ;;  %4036 = vrsqrt.f32 %v514_v10 }
 0x130   : > { %v517_v57 = vmul.f32 %v444_v55, %v396_v31  ;;  %v516_v15 = vmul.f32 %v442_v56, %v394_v43  ;;  %v4027_v24 = vpop.eup %4026 }
 0x131   : > { %v4029_v38 = vpop.eup %4028 }
 0x132   : > { %4038 = vrsqrt.f32 %v517_v57 }
 0x133   : > { %v448_v59 = vpop.xlane.xlu1 %447  ;;  %v446_v60 = vpop.xlane.xlu0 %445  ;;  %4040 = vrsqrt.f32 %v516_v15 }
 0x134   : > { %v518_v61 = vmul.f32 %v446_v60, %v398_v44  ;;  %v519_v20 = vmul.f32 %v448_v59, %v400_v32  ;;  %v4031_v17 = vpop.eup %4030  ;;  %v4534_v32 = vsub.s32 4, %v4517_v33  ;;  %v4537_v44 = vsub.s32 5, %v4517_v33 }
 0x135   : > { %v4033_v39 = vpop.eup %4032 }
 0x136   : > { %4042 = vrsqrt.f32 %v519_v20 }
 0x137   : > { %v452_v0 = vpop.xlane.xlu1 %451  ;;  %v450_v1 = vpop.xlane.xlu0 %449  ;;  %4044 = vrsqrt.f32 %v518_v61 }
 0x138   : > { %v521_v7 = vmul.f32 %v452_v0, %v404_v45  ;;  %v520_v8 = vmul.f32 %v450_v1, %v402_v46  ;;  %v4035_v42 = vpop.eup %4034  ;;  %v4540_v45 = vsub.s32 6, %v4517_v33 }
 0x139   : > { %v4037_v46 = vpop.eup %4036 }
 0x13a   : > { %4046 = vrsqrt.f32 %v521_v7 }
 0x13b   : > { %v456_v13 = vpop.xlane.xlu1 %455  ;;  %v454_v14 = vpop.xlane.xlu0 %453  ;;  %4048 = vrsqrt.f32 %v520_v8 }
 0x13c   : > { %v523_v18 = vmul.f32 %v456_v13, %v408_v36  ;;  %v522_v19 = vmul.f32 %v454_v14, %v406_v47  ;;  %v4039_v49 = vpop.eup %4038 }
 0x13d   : > { %v4041_v53 = vpop.eup %4040 }
 0x13e   : > { %4050 = vrsqrt.f32 %v523_v18 }
 0x13f   : > { %v478_v25 = vpop.xlane.xlu1 %477  ;;  %v458_v28 = vpop.xlane.xlu0 %457  ;;  %4052 = vrsqrt.f32 %v522_v19 }
 0x140   : > { %v542_v29 = vmul.f32 %v4027_v24, %v478_v25  ;;  %v524_v30 = vmul.f32 %v458_v28, %v410_v48  ;;  %v4043_v58 = vpop.eup %4042 }
 0x141   : > { %v4045_v1 = vpop.eup %4044 }
 0x142   : > { %v558_v3 = vsub.f32 1.0, %v542_v29  ;;  %4054 = vrsqrt.f32 %v524_v30 }
 0x143   : > { %v460_v5 = vpop.xlane.xlu1 %459  ;;  %v480_v4 = vpop.xlane.xlu0 %479 }
 0x144   : > { %v574_v11 = vadd.f32 1e-08, %v558_v3  ;;  %v525_v12 = vmul.f32 %v460_v5, %v412_v37  ;;  %v543_v16 = vmul.f32 %v4029_v38, %v480_v4  ;;  %v4570_v10 = vpop.eup %4046 }
 0x145   : > { %v4574_v19 = vpop.eup %4048 }
 0x146   : > { %v4528_v27 = vmul.f32 10.0, %v574_v11  ;;  %v559_v40 = vsub.f32 1.0, %v543_v16  ;;  %4056 = vrsqrt.f32 %v525_v12 }
 0x147   : > { %v484_v31 = vpop.xlane.xlu1 %483  ;;  %v482_v43 = vpop.xlane.xlu0 %481 }
 0x148   : > { %v606_v36 = vsub.f32 0.2, %v4528_v27  ;;  %v4545_v47 = vmul.f32 %v4528_v27, %v4528_v27  ;;  %v575_v37 = vadd.f32 1e-08, %v559_v40  ;;  %v545_v48 = vmul.f32 %v4031_v17, %v484_v31  ;;  %v4582_v29 = vpop.eup %4050 }
 0x149   : > { %v544_v50 = vmul.f32 %v4033_v39, %v482_v43  ;;  %v4588_v4 = vpop.eup %4052 }
 0x14a   : > { %v622_v54 = vmax.f32 %v606_v36, 0.0  ;;  %v4553_v55 = vmul.f32 10.0, %v575_v37  ;;  %v561_v56 = vsub.f32 1.0, %v545_v48  ;;  %v674_v57 = vrot.slane %v4545_v47, %v4520_v2 }
 0x14b   : > { %v560_v59 = vsub.f32 1.0, %v544_v50  ;;  %v488_v60 = vpop.xlane.xlu1 %487  ;;  %v486_v61 = vpop.xlane.xlu0 %485  ;;  %v678_v62 = vrot.slane %v4545_v47, %v4523_v21  ;;  %v682_v63 = vrot.slane %v4545_v47, %v4526_v22  ;;  %v686_v0 = vrot.slane %v4545_v47, %v4531_v41 }
 0x14c   : > { %v4563_v6 = vmul.f32 %v622_v54, %v622_v54  ;;  %v607_v7 = vsub.f32 0.2, %v4553_v55  ;;  %v4568_v8 = vmul.f32 %v4553_v55, %v4553_v55  ;;  %v577_v9 = vadd.f32 1e-08, %v561_v56  ;;  %v4597_v26 = vpop.eup %4054 }
 0x14d   : > { %v576_v13 = vadd.f32 1e-08, %v560_v59  ;;  %v547_v14 = vmul.f32 %v4035_v42, %v488_v60  ;;  %v546_v15 = vmul.f32 %v4037_v46, %v486_v61  ;;  %v690_v18 = vrot.slane %v4545_v47, %v4534_v32 }
 0x14e   : > { %v623_v20 = vmax.f32 %v607_v7, 0.0  ;;  %v4576_v24 = vmul.f32 10.0, %v577_v9  ;;  %v694_v25 = vrot.slane %v4545_v47, %v4537_v44  ;;  %v698_v28 = vrot.slane %v4545_v47, %v4540_v45 }
 0x14f   : > { %v4584_v30 = vmul.f32 10.0, %v576_v13  ;;  %v563_v34 = vsub.f32 1.0, %v547_v14  ;;  %v562_v35 = vsub.f32 1.0, %v546_v15  ;;  %v492_v3 = vpop.xlane.xlu1 %491  ;;  %v490_v38 = vpop.xlane.xlu0 %489  ;;  %v702_v5 = vrot.slane %v4545_v47, %v4548_v51 }
 0x150   : > { %v4590_v11 = vmul.f32 %v623_v20, %v623_v20  ;;  %v609_v12 = vsub.f32 0.2, %v4576_v24  ;;  %v4595_v16 = vmul.f32 %v4576_v24, %v4576_v24  ;;  %v549_v17 = vmul.f32 %v4039_v49, %v492_v3  ;;  %v4604_v37 = vpop.eup %4056 }
 0x151   : > { %v608_v39 = vsub.f32 0.2, %v4584_v30  ;;  %v4602_v40 = vmul.f32 %v4584_v30, %v4584_v30  ;;  %v579_v42 = vadd.f32 1e-08, %v563_v34  ;;  %v578_v31 = vadd.f32 1e-08, %v562_v35 }
 0x152   : > { %v625_v43 = vmax.f32 %v609_v12, 0.0  ;;  %v565_v46 = vsub.f32 1.0, %v549_v17  ;;  %v548_v36 = vmul.f32 %v4041_v53, %v490_v38  ;;  %v1183_v47 = vcombine.low %v674_v57, %v678_v62 }
 0x153   : > { %v624_v48 = vmax.f32 %v608_v39, 0.0  ;;  %v4606_v50 = vmul.f32 10.0, %v579_v42  ;;  %v4608_v49 = vmul.f32 10.0, %v578_v31  ;;  %v496_v54 = vpop.xlane.xlu1 %495  ;;  %v1184_v56 = vcombine.low %v682_v63, %v686_v0  ;;  %v494_v9 = vpop.xlane.xlu0 %493 }
 0x154   : > { %v4610_v59 = vmul.f32 %v625_v43, %v625_v43  ;;  %v581_v60 = vadd.f32 1e-08, %v565_v46  ;;  %v564_v61 = vsub.f32 1.0, %v548_v36  ;;  %v551_v7 = vmul.f32 %v4043_v58, %v496_v54 }
 0x155   : > { %5710 = vst [vmem:[#allocation14_spill] sm:$0xff] %v4606_v50  ;;  %5711 = vst [vmem:[#allocation15_spill] sm:$0xff] %v4608_v49  ;;  %v4612_v13 = vmul.f32 %v624_v48, %v624_v48  ;;  %v611_v53 = vsub.f32 0.2, %v4606_v50  ;;  %v4617_v57 = vmul.f32 %v4606_v50, %v4606_v50  ;;  %v610_v62 = vsub.f32 0.2, %v4608_v49 }
 0x156   : > { %v4622_v14 = vmul.f32 %v4608_v49, %v4608_v49  ;;  %v4624_v63 = vmul.f32 10.0, %v581_v60  ;;  %v580_v0 = vadd.f32 1e-08, %v564_v61  ;;  %v567_v15 = vsub.f32 1.0, %v551_v7 }
 0x157   : > { %v627_v58 = vmax.f32 %v611_v53, 0.0  ;;  %v626_v20 = vmax.f32 %v610_v62, 0.0  ;;  %v550_v34 = vmul.f32 %v4045_v1, %v494_v9  ;;  %v1185_v35 = vcombine.low %v690_v18, %v694_v25  ;;  %v500_v25 = vpop.xlane.xlu1 %499  ;;  %v498_v7 = vpop.xlane.xlu0 %497 }
 0x158   : > { %5712 = vst [vmem:[#allocation16_spill] sm:$0xff] %v4624_v63  ;;  %v613_v3 = vsub.f32 0.2, %v4624_v63  ;;  %v4629_v38 = vmul.f32 %v4624_v63, %v4624_v63  ;;  %v4631_v12 = vmul.f32 10.0, %v580_v0  ;;  %v583_v17 = vadd.f32 1e-08, %v567_v15 }
 0x159   : > { %v4633_v39 = vmul.f32 %v627_v58, %v627_v58  ;;  %v4635_v42 = vmul.f32 %v626_v20, %v626_v20  ;;  %v566_v31 = vsub.f32 1.0, %v550_v34  ;;  %v1186_v43 = vcombine.low %v698_v28, %v702_v5 }
 0x15a   : > { %5713 = vst [vmem:[#allocation17_spill] sm:$0xff] %v4631_v12  ;;  %v629_v46 = vmax.f32 %v613_v3, 0.0  ;;  %v612_v36 = vsub.f32 0.2, %v4631_v12  ;;  %v4640_v1 = vmul.f32 %v4631_v12, %v4631_v12  ;;  %v4642_v18 = vmul.f32 10.0, %v583_v17 }
 0x15b   : > { %v582_v48 = vadd.f32 1e-08, %v566_v31  ;;  %v1193_v54 = vrot.slane %v1183_v47, %v4551_v52  ;;  %v1200_v60 = vrot.slane %v1184_v56, %v4551_v52  ;;  %v1207_v61 = vrot.slane %v1185_v35, %v4551_v52 }
 0x15c   : > { %5714 = vst [vmem:[#allocation18_spill] sm:$0xff] %v4642_v18  ;;  %v4647_v9 = vmul.f32 %v629_v46, %v629_v46  ;;  %v628_v28 = vmax.f32 %v612_v36, 0.0  ;;  %v615_v5 = vsub.f32 0.2, %v4642_v18  ;;  %v4652_v53 = vmul.f32 %v4642_v18, %v4642_v18 }
 0x15d   : > { %v4654_v62 = vmul.f32 10.0, %v582_v48  ;;  %v1214_v0 = vrot.slane %v1186_v43, %v4551_v52  ;;  %v1215_v15 = vcombine.low %v1193_v54, %v1200_v60  ;;  %v553_v47 = vmul.f32 %v4570_v10, %v500_v25 }
 0x15e   : > { %v4658_v56 = vmul.f32 %v628_v28, %v628_v28  ;;  %v631_v58 = vmax.f32 %v615_v5, 0.0  ;;  %v552_v20 = vmul.f32 %v4574_v19, %v498_v7  ;;  %v706_v34 = vrot.slane %v4568_v8, %v4520_v2  ;;  %v504_v5 = vpop.xlane.xlu1 %503 }
 0x15f   : > { %5715 = vst [vmem:[#allocation19_spill] sm:$0xff] %v4654_v62  ;;  %v614_v35 = vsub.f32 0.2, %v4654_v62  ;;  %v4666_v3 = vmul.f32 %v4654_v62, %v4654_v62  ;;  %v1216_v17 = vcombine.low %v1207_v61, %v1214_v0  ;;  %v1223_v31 = vrot.slane %v1215_v15, %v4551_v52  ;;  %v502_v0 = vpop.xlane.xlu0 %501 }
 0x160   : > { %v4669_v43 = vmul.f32 %v631_v58, %v631_v58  ;;  %v569_v10 = vsub.f32 1.0, %v553_v47  ;;  %v568_v46 = vsub.f32 1.0, %v552_v20  ;;  %v710_v36 = vrot.slane %v4568_v8, %v4523_v21 }
 0x161   : > { %v630_v19 = vmax.f32 %v614_v35, 0.0  ;;  %v1230_v25 = vrot.slane %v1216_v17, %v4551_v52  ;;  %v714_v48 = vrot.slane %v4568_v8, %v4526_v22  ;;  %v718_v54 = vrot.slane %v4568_v8, %v4531_v41 }
 0x162   : > { %v585_v60 = vadd.f32 1e-08, %v569_v10  ;;  %v584_v61 = vadd.f32 1e-08, %v568_v46  ;;  %v722_v7 = vrot.slane %v4568_v8, %v4534_v32  ;;  %v726_v28 = vrot.slane %v4568_v8, %v4537_v44 }
 0x163   : > { %v4682_v15 = vmul.f32 %v630_v19, %v630_v19  ;;  %v1231_v47 = vcombine.low %v1223_v31, %v1230_v25  ;;  %v730_v58 = vrot.slane %v4568_v8, %v4540_v45  ;;  %v734_v20 = vrot.slane %v4568_v8, %v4548_v51 }
 0x164   : > { %v4688_v35 = vmul.f32 10.0, %v585_v60  ;;  %v4690_v17 = vmul.f32 10.0, %v584_v61  ;;  %v1232_v10 = vcombine.low %v706_v34, %v710_v36  ;;  %v1233_v46 = vcombine.low %v714_v48, %v718_v54 }
 0x165   : > { %1968 = vperm.xlu0 %4024, %v1231_v47   ;;  %v1234_v23 = vcombine.low %v722_v7, %v726_v28  ;;  %v1235_v62 = vcombine.low %v730_v58, %v734_v20  ;;  %v555_v63 = vmul.f32 %v4582_v29, %v504_v5  ;;  %v554_v19 = vmul.f32 %v4588_v4, %v502_v0 }
 0x166   : > { %5716 = vst [vmem:[#allocation20_spill] sm:$0xff] %v4688_v35  ;;  %5717 = vst [vmem:[#allocation21_spill] sm:$0xff] %v4690_v17  ;;  %v617_v31 = vsub.f32 0.2, %v4688_v35  ;;  %v4697_v25 = vmul.f32 %v4688_v35, %v4688_v35  ;;  %v616_v8 = vsub.f32 0.2, %v4690_v17  ;;  %v4702_v60 = vmul.f32 %v4690_v17, %v4690_v17 }
 0x167   : > { %v1242_v34 = vrot.slane %v1232_v10, %v4551_v52  ;;  %v1249_v36 = vrot.slane %v1233_v46, %v4551_v52  ;;  %v1256_v29 = vrot.slane %v1234_v23, %v4551_v52  ;;  %v1263_v4 = vrot.slane %v1235_v62, %v4551_v52 }
 0x168   : > { %v633_v48 = vmax.f32 %v617_v31, 0.0  ;;  %v632_v54 = vmax.f32 %v616_v8, 0.0  ;;  %v571_v61 = vsub.f32 1.0, %v555_v63  ;;  %v570_v7 = vsub.f32 1.0, %v554_v19 }
 0x169   : > { %v1264_v28 = vcombine.low %v1242_v34, %v1249_v36  ;;  %v1265_v5 = vcombine.low %v1256_v29, %v1263_v4  ;;  %v738_v0 = vrot.slane %v4602_v40, %v4520_v2  ;;  %v742_v47 = vrot.slane %v4602_v40, %v4523_v21 }
 0x16a   : > { %v4712_v58 = vmul.f32 %v633_v48, %v633_v48  ;;  %v4714_v20 = vmul.f32 %v632_v54, %v632_v54  ;;  %v587_v10 = vadd.f32 1e-08, %v571_v61  ;;  %v586_v23 = vadd.f32 1e-08, %v570_v7  ;;  %v508_v61 = vpop.xlane.xlu1 %507  ;;  %v506_v7 = vpop.xlane.xlu0 %505 }
 0x16b   : > { %v1272_v62 = vrot.slane %v1264_v28, %v4551_v52  ;;  %v1279_v46 = vrot.slane %v1265_v5, %v4551_v52  ;;  %v746_v63 = vrot.slane %v4602_v40, %v4526_v22  ;;  %v750_v19 = vrot.slane %v4602_v40, %v4531_v41 }
 0x16c   : > { %v4722_v31 = vmul.f32 10.0, %v587_v10  ;;  %v4724_v8 = vmul.f32 10.0, %v586_v23  ;;  %v754_v34 = vrot.slane %v4602_v40, %v4534_v32  ;;  %v758_v36 = vrot.slane %v4602_v40, %v4537_v44 }
 0x16d   : > { %v1280_v29 = vcombine.low %v1272_v62, %v1279_v46  ;;  %v762_v4 = vrot.slane %v4602_v40, %v4540_v45  ;;  %v766_v48 = vrot.slane %v4602_v40, %v4548_v51  ;;  %v1281_v54 = vcombine.low %v738_v0, %v742_v47 }
 0x16e   : > { %5718 = vst [vmem:[#allocation22_spill] sm:$0xff] %v4722_v31  ;;  %5719 = vst [vmem:[#allocation23_spill] sm:$0xff] %v4724_v8  ;;  %v619_v28 = vsub.f32 0.2, %v4722_v31  ;;  %v4737_v5 = vmul.f32 %v4722_v31, %v4722_v31  ;;  %v618_v10 = vsub.f32 0.2, %v4724_v8  ;;  %v4742_v23 = vmul.f32 %v4724_v8, %v4724_v8 }
 0x16f   : > { %1971 = vperm.xlu1 %4025, %v1280_v29   ;;  %v1282_v62 = vcombine.low %v746_v63, %v750_v19  ;;  %v1283_v46 = vcombine.low %v754_v34, %v758_v36  ;;  %v1284_v35 = vcombine.low %v762_v4, %v766_v48  ;;  %v1291_v40 = vrot.slane %v1281_v54, %v4551_v52 }
 0x170   : > { %v635_v0 = vmax.f32 %v619_v28, 0.0  ;;  %v634_v47 = vmax.f32 %v618_v10, 0.0  ;;  %v557_v17 = vmul.f32 %v4604_v37, %v508_v61  ;;  %v556_v18 = vmul.f32 %v4597_v26, %v506_v7 }
 0x171   : > { %v1298_v31 = vrot.slane %v1282_v62, %v4551_v52  ;;  %v1305_v12 = vrot.slane %v1283_v46, %v4551_v52  ;;  %v1312_v50 = vrot.slane %v1284_v35, %v4551_v52  ;;  %v770_v29 = vrot.slane %v4595_v16, %v4520_v2 }
 0x172   : > { %v4752_v63 = vmul.f32 %v635_v0, %v635_v0  ;;  %v4754_v19 = vmul.f32 %v634_v47, %v634_v47  ;;  %v573_v34 = vsub.f32 1.0, %v557_v17  ;;  %v572_v36 = vsub.f32 1.0, %v556_v18 }
 0x173   : > { %v1313_v4 = vcombine.low %v1291_v40, %v1298_v31  ;;  %v1314_v48 = vcombine.low %v1305_v12, %v1312_v50  ;;  %v774_v26 = vrot.slane %v4595_v16, %v4523_v21  ;;  %v778_v37 = vrot.slane %v4595_v16, %v4526_v22 }
 0x174   : > { %v589_v54 = vadd.f32 1e-08, %v573_v34  ;;  %v588_v61 = vadd.f32 1e-08, %v572_v36  ;;  %v782_v35 = vrot.slane %v4595_v16, %v4531_v41  ;;  %v786_v7 = vrot.slane %v4595_v16, %v4534_v32 }
 0x175   : > { %v1321_v28 = vrot.slane %v1313_v4, %v4551_v52  ;;  %v1328_v18 = vrot.slane %v1314_v48, %v4551_v52  ;;  %v790_v50 = vrot.slane %v4595_v16, %v4537_v44  ;;  %v794_v12 = vrot.slane %v4595_v16, %v4540_v45 }
 0x176   : > { %v4770_v17 = vmul.f32 10.0, %v589_v54  ;;  %v4772_v31 = vmul.f32 10.0, %v588_v61  ;;  %v798_v10 = vrot.slane %v4595_v16, %v4548_v51  ;;  %v1330_v62 = vcombine.low %v770_v29, %v774_v26 }
 0x177   : > { %v1329_v46 = vcombine.low %v1321_v28, %v1328_v18  ;;  %v1331_v40 = vcombine.low %v778_v37, %v782_v35  ;;  %v1332_v0 = vcombine.low %v786_v7, %v790_v50  ;;  %v802_v47 = vrot.slane %v4622_v14, %v4520_v2 }
 0x178   : > { %5720 = vst [vmem:[#allocation24_spill] sm:$0xff] %v4770_v17  ;;  %5721 = vst [vmem:[#allocation25_spill] sm:$0xff] %v4772_v31  ;;  %v621_v34 = vsub.f32 0.2, %v4770_v17  ;;  %v4781_v36 = vmul.f32 %v4770_v17, %v4770_v17  ;;  %v620_v4 = vsub.f32 0.2, %v4772_v31  ;;  %v4786_v48 = vmul.f32 %v4772_v31, %v4772_v31 }
 0x179   : > { %1974 = vperm.xlu1 %4025, %v1329_v46   ;;  %v1333_v16 = vcombine.low %v794_v12, %v798_v10  ;;  %v1340_v29 = vrot.slane %v1330_v62, %v4551_v52  ;;  %v1347_v26 = vrot.slane %v1331_v40, %v4551_v52  ;;  %v1354_v37 = vrot.slane %v1332_v0, %v4551_v52 }
 0x17a   : > { %v637_v54 = vmax.f32 %v621_v34, 0.0  ;;  %v636_v61 = vmax.f32 %v620_v4, 0.0  ;;  %v806_v35 = vrot.slane %v4622_v14, %v4523_v21  ;;  %v810_v7 = vrot.slane %v4622_v14, %v4526_v22 }
 0x17b   : > { %v1361_v28 = vrot.slane %v1333_v16, %v4551_v52  ;;  %v1362_v18 = vcombine.low %v1340_v29, %v1347_v26  ;;  %v814_v50 = vrot.slane %v4622_v14, %v4531_v41  ;;  %v818_v12 = vrot.slane %v4622_v14, %v4534_v32 }
 0x17c   : > { %v4800_v10 = vmul.f32 %v637_v54, %v637_v54  ;;  %v4802_v62 = vmul.f32 %v636_v61, %v636_v61  ;;  %v822_v46 = vrot.slane %v4622_v14, %v4537_v44  ;;  %v826_v40 = vrot.slane %v4622_v14, %v4540_v45 }
 0x17d   : > { %v1363_v0 = vcombine.low %v1354_v37, %v1361_v28  ;;  %v1370_v34 = vrot.slane %v1362_v18, %v4551_v52  ;;  %v830_v4 = vrot.slane %v4622_v14, %v4548_v51  ;;  %v1379_v16 = vcombine.low %v802_v47, %v806_v35 }
 0x17e   : > { %v1380_v29 = vcombine.low %v810_v7, %v814_v50  ;;  %v1381_v26 = vcombine.low %v818_v12, %v822_v46  ;;  %v962_v54 = vrot.slane %v4652_v53, %v4520_v2  ;;  %v966_v61 = vrot.slane %v4652_v53, %v4523_v21 }
 0x17f   : > { %v1377_v17 = vrot.slane %v1363_v0, %v4551_v52  ;;  %v1382_v31 = vcombine.low %v826_v40, %v830_v4  ;;  %v1389_v8 = vrot.slane %v1379_v16, %v4551_v52  ;;  %v970_v37 = vrot.slane %v4652_v53, %v4526_v22 }
 0x180   : > { %v1396_v28 = vrot.slane %v1380_v29, %v4551_v52  ;;  %v1403_v14 = vrot.slane %v1381_v26, %v4551_v52  ;;  %v974_v47 = vrot.slane %v4652_v53, %v4531_v41  ;;  %v978_v35 = vrot.slane %v4652_v53, %v4534_v32 }
 0x181   : > { %v1378_v7 = vcombine.low %v1370_v34, %v1377_v17  ;;  %v1410_v18 = vrot.slane %v1382_v31, %v4551_v52  ;;  %v982_v50 = vrot.slane %v4652_v53, %v4537_v44  ;;  %v986_v12 = vrot.slane %v4652_v53, %v4540_v45 }
 0x182   : > { %v1411_v46 = vcombine.low %v1389_v8, %v1396_v28  ;;  %v990_v40 = vrot.slane %v4652_v53, %v4548_v51  ;;  %v1624_v0 = vcombine.low %v962_v54, %v966_v61  ;;  %v1625_v4 = vcombine.low %v970_v37, %v974_v47 }
 0x183   : > { %1977 = vperm.xlu1 %4025, %v1378_v7   ;;  %v1412_v16 = vcombine.low %v1403_v14, %v1410_v18  ;;  %v1626_v29 = vcombine.low %v978_v35, %v982_v50  ;;  %v834_v17 = vrot.slane %v4617_v57, %v4520_v2  ;;  %v838_v31 = vrot.slane %v4617_v57, %v4523_v21 }
 0x184   : > { %v1419_v34 = vrot.slane %v1411_v46, %v4551_v52  ;;  %v1627_v26 = vcombine.low %v986_v12, %v990_v40  ;;  %v1634_v49 = vrot.slane %v1624_v0, %v4551_v52  ;;  %v1641_v8 = vrot.slane %v1625_v4, %v4551_v52 }
 0x185   : > { %v1426_v53 = vrot.slane %v1412_v16, %v4551_v52  ;;  %v1648_v54 = vrot.slane %v1626_v29, %v4551_v52  ;;  %v842_v61 = vrot.slane %v4617_v57, %v4526_v22  ;;  %v846_v37 = vrot.slane %v4617_v57, %v4531_v41 }
 0x186   : > { %v1655_v28 = vrot.slane %v1627_v26, %v4551_v52  ;;  %v1656_v14 = vcombine.low %v1634_v49, %v1641_v8  ;;  %v850_v47 = vrot.slane %v4617_v57, %v4534_v32  ;;  %v854_v35 = vrot.slane %v4617_v57, %v4537_v44 }
 0x187   : > { %v1427_v7 = vcombine.low %v1419_v34, %v1426_v53  ;;  %v858_v18 = vrot.slane %v4617_v57, %v4540_v45  ;;  %v862_v50 = vrot.slane %v4617_v57, %v4548_v51  ;;  %v1428_v12 = vcombine.low %v834_v17, %v838_v31 }
 0x188   : > { %v1657_v46 = vcombine.low %v1648_v54, %v1655_v28  ;;  %v1664_v40 = vrot.slane %v1656_v14, %v4551_v52  ;;  %v1429_v0 = vcombine.low %v842_v61, %v846_v37  ;;  %v1430_v4 = vcombine.low %v850_v47, %v854_v35 }
 0x189   : > { %1980 = vperm.xlu1 %4025, %v1427_v7   ;;  %v1431_v49 = vcombine.low %v858_v18, %v862_v50  ;;  %v1438_v16 = vrot.slane %v1428_v12, %v4551_v52  ;;  %v2209_v29 = vrot.slane %v4590_v11, %v4520_v2  ;;  %v2213_v34 = vrot.slane %v4590_v11, %v4523_v21 }
 0x18a   : > { %v1671_v26 = vrot.slane %v1657_v46, %v4551_v52  ;;  %v1445_v57 = vrot.slane %v1429_v0, %v4551_v52  ;;  %v1452_v17 = vrot.slane %v1430_v4, %v4551_v52  ;;  %v2217_v31 = vrot.slane %v4590_v11, %v4526_v22 }
 0x18b   : > { %v1459_v8 = vrot.slane %v1431_v49, %v4551_v52  ;;  %v2221_v53 = vrot.slane %v4590_v11, %v4531_v41  ;;  %v2225_v54 = vrot.slane %v4590_v11, %v4534_v32  ;;  %v2229_v61 = vrot.slane %v4590_v11, %v4537_v44 }
 0x18c   : > { %v1672_v37 = vcombine.low %v1664_v40, %v1671_v26  ;;  %v1460_v28 = vcombine.low %v1438_v16, %v1445_v57  ;;  %v2233_v14 = vrot.slane %v4590_v11, %v4540_v45  ;;  %v2237_v47 = vrot.slane %v4590_v11, %v4548_v51 }
 0x18d   : > { %v1461_v35 = vcombine.low %v1452_v17, %v1459_v8  ;;  %v2735_v7 = vcombine.low %v2209_v29, %v2213_v34  ;;  %v2736_v18 = vcombine.low %v2217_v31, %v2221_v53  ;;  %v2737_v50 = vcombine.low %v2225_v54, %v2229_v61 }
 0x18e   : > { %1995 = vperm.xlu0 %4024, %v1672_v37   ;;  %v1468_v12 = vrot.slane %v1460_v28, %v4551_v52  ;;  %v2738_v46 = vcombine.low %v2233_v14, %v2237_v47  ;;  %v866_v0 = vrot.slane %v4640_v1, %v4520_v2  ;;  %v870_v40 = vrot.slane %v4640_v1, %v4523_v21 }
 0x18f   : > { %v1475_v4 = vrot.slane %v1461_v35, %v4551_v52  ;;  %v2745_v49 = vrot.slane %v2735_v7, %v4551_v52  ;;  %v2752_v11 = vrot.slane %v2736_v18, %v4551_v52  ;;  %v2759_v16 = vrot.slane %v2737_v50, %v4551_v52 }
 0x190   : > { %v2766_v29 = vrot.slane %v2738_v46, %v4551_v52  ;;  %v874_v34 = vrot.slane %v4640_v1, %v4526_v22  ;;  %v878_v26 = vrot.slane %v4640_v1, %v4531_v41  ;;  %v882_v57 = vrot.slane %v4640_v1, %v4534_v32 }
 0x191   : > { %v1476_v17 = vcombine.low %v1468_v12, %v1475_v4  ;;  %v2767_v31 = vcombine.low %v2745_v49, %v2752_v11  ;;  %v886_v8 = vrot.slane %v4640_v1, %v4537_v44  ;;  %v890_v53 = vrot.slane %v4640_v1, %v4540_v45 }
 0x192   : > { %v2768_v54 = vcombine.low %v2759_v16, %v2766_v29  ;;  %v894_v61 = vrot.slane %v4640_v1, %v4548_v51  ;;  %v1477_v37 = vcombine.low %v866_v0, %v870_v40  ;;  %v1478_v28 = vcombine.low %v874_v34, %v878_v26 }
 0x193   : > { %1983 = vperm.xlu1 %4025, %v1476_v17   ;;  %v2775_v14 = vrot.slane %v2767_v31, %v4551_v52  ;;  %v1479_v47 = vcombine.low %v882_v57, %v886_v8  ;;  %v2273_v35 = vrot.slane %v4610_v59, %v4520_v2  ;;  %v2277_v7 = vrot.slane %v4610_v59, %v4523_v21 }
 0x194   : > { %v2782_v18 = vrot.slane %v2768_v54, %v4551_v52  ;;  %v1480_v50 = vcombine.low %v890_v53, %v894_v61  ;;  %v1487_v12 = vrot.slane %v1477_v37, %v4551_v52  ;;  %v1494_v46 = vrot.slane %v1478_v28, %v4551_v52 }
 0x195   : > { %v1501_v1 = vrot.slane %v1479_v47, %v4551_v52  ;;  %v2281_v0 = vrot.slane %v4610_v59, %v4526_v22  ;;  %v2285_v40 = vrot.slane %v4610_v59, %v4531_v41  ;;  %v2289_v4 = vrot.slane %v4610_v59, %v4534_v32 }
 0x196   : > { %v2783_v49 = vcombine.low %v2775_v14, %v2782_v18  ;;  %v1508_v11 = vrot.slane %v1480_v50, %v4551_v52  ;;  %v1509_v16 = vcombine.low %v1487_v12, %v1494_v46  ;;  %v2293_v29 = vrot.slane %v4610_v59, %v4537_v44 }
 0x197   : > { %v2297_v34 = vrot.slane %v4610_v59, %v4540_v45  ;;  %v2301_v26 = vrot.slane %v4610_v59, %v4548_v51  ;;  %v2833_v57 = vcombine.low %v2273_v35, %v2277_v7  ;;  %v2834_v17 = vcombine.low %v2281_v0, %v2285_v40 }
 0x198   : > { %3474 = vperm.xlu0 %4024, %v2783_v49   ;;  %v1510_v31 = vcombine.low %v1501_v1, %v1508_v11  ;;  %v1517_v8 = vrot.slane %v1509_v16, %v4551_v52  ;;  %v2835_v53 = vcombine.low %v2289_v4, %v2293_v29  ;;  %v898_v54 = vrot.slane %v4629_v38, %v4520_v2 }
 0x199   : > { %v2836_v61 = vcombine.low %v2297_v34, %v2301_v26  ;;  %v2843_v37 = vrot.slane %v2833_v57, %v4551_v52  ;;  %v2850_v28 = vrot.slane %v2834_v17, %v4551_v52  ;;  %v902_v14 = vrot.slane %v4629_v38, %v4523_v21 }
 0x19a   : > { %v1524_v59 = vrot.slane %v1510_v31, %v4551_v52  ;;  %v2857_v47 = vrot.slane %v2835_v53, %v4551_v52  ;;  %v906_v35 = vrot.slane %v4629_v38, %v4526_v22  ;;  %v910_v7 = vrot.slane %v4629_v38, %v4531_v41 }
 0x19b   : > { %v2864_v18 = vrot.slane %v2836_v61, %v4551_v52  ;;  %v2865_v50 = vcombine.low %v2843_v37, %v2850_v28  ;;  %v914_v12 = vrot.slane %v4629_v38, %v4534_v32  ;;  %v918_v46 = vrot.slane %v4629_v38, %v4537_v44 }
 0x19c   : > { %v1525_v1 = vcombine.low %v1517_v8, %v1524_v59  ;;  %v922_v0 = vrot.slane %v4629_v38, %v4540_v45  ;;  %v926_v40 = vrot.slane %v4629_v38, %v4548_v51  ;;  %v1526_v4 = vcombine.low %v898_v54, %v902_v14 }
 0x19d   : > { %v2866_v49 = vcombine.low %v2857_v47, %v2864_v18  ;;  %v2873_v11 = vrot.slane %v2865_v50, %v4551_v52  ;;  %v1527_v16 = vcombine.low %v906_v35, %v910_v7  ;;  %v1528_v29 = vcombine.low %v914_v12, %v918_v46 }
 0x19e   : > { %1986 = vperm.xlu1 %4025, %v1525_v1   ;;  %v1529_v34 = vcombine.low %v922_v0, %v926_v40  ;;  %v1536_v26 = vrot.slane %v1526_v4, %v4551_v52  ;;  %v2337_v57 = vrot.slane %v4633_v39, %v4520_v2  ;;  %v2341_v17 = vrot.slane %v4633_v39, %v4523_v21 }
 0x19f   : > { %v2880_v31 = vrot.slane %v2866_v49, %v4551_v52  ;;  %v1543_v38 = vrot.slane %v1527_v16, %v4551_v52  ;;  %v1550_v8 = vrot.slane %v1528_v29, %v4551_v52  ;;  %v2345_v53 = vrot.slane %v4633_v39, %v4526_v22 }
 0x1a0   : > { %v1557_v54 = vrot.slane %v1529_v34, %v4551_v52  ;;  %v2349_v61 = vrot.slane %v4633_v39, %v4531_v41  ;;  %v2353_v37 = vrot.slane %v4633_v39, %v4534_v32  ;;  %v2357_v28 = vrot.slane %v4633_v39, %v4537_v44 }
 0x1a1   : > { %v2881_v14 = vcombine.low %v2873_v11, %v2880_v31  ;;  %v1558_v59 = vcombine.low %v1536_v26, %v1543_v38  ;;  %v2361_v47 = vrot.slane %v4633_v39, %v4540_v45  ;;  %v2365_v35 = vrot.slane %v4633_v39, %v4548_v51 }
 0x1a2   : > { %v1559_v7 = vcombine.low %v1550_v8, %v1557_v54  ;;  %v2931_v18 = vcombine.low %v2337_v57, %v2341_v17  ;;  %v2932_v50 = vcombine.low %v2345_v53, %v2349_v61  ;;  %v2933_v12 = vcombine.low %v2353_v37, %v2357_v28 }
 0x1a3   : > { %3480 = vperm.xlu0 %4024, %v2881_v14   ;;  %v1566_v46 = vrot.slane %v1558_v59, %v4551_v52  ;;  %v2934_v1 = vcombine.low %v2361_v47, %v2365_v35  ;;  %v930_v0 = vrot.slane %v4666_v3, %v4520_v2  ;;  %v934_v40 = vrot.slane %v4666_v3, %v4523_v21 }
 0x1a4   : > { %v1573_v4 = vrot.slane %v1559_v7, %v4551_v52  ;;  %v2941_v49 = vrot.slane %v2931_v18, %v4551_v52  ;;  %v2948_v39 = vrot.slane %v2932_v50, %v4551_v52  ;;  %v2955_v11 = vrot.slane %v2933_v12, %v4551_v52 }
 0x1a5   : > { %v2962_v16 = vrot.slane %v2934_v1, %v4551_v52  ;;  %v938_v29 = vrot.slane %v4666_v3, %v4526_v22  ;;  %v942_v34 = vrot.slane %v4666_v3, %v4531_v41  ;;  %v946_v26 = vrot.slane %v4666_v3, %v4534_v32 }
 0x1a6   : > { %v1574_v57 = vcombine.low %v1566_v46, %v1573_v4  ;;  %v2963_v17 = vcombine.low %v2941_v49, %v2948_v39  ;;  %v950_v31 = vrot.slane %v4666_v3, %v4537_v44  ;;  %v954_v38 = vrot.slane %v4666_v3, %v4540_v45 }
 0x1a7   : > { %v2964_v8 = vcombine.low %v2955_v11, %v2962_v16  ;;  %v958_v53 = vrot.slane %v4666_v3, %v4548_v51  ;;  %v1575_v54 = vcombine.low %v930_v0, %v934_v40  ;;  %v1576_v61 = vcombine.low %v938_v29, %v942_v34 }
 0x1a8   : > { %1989 = vperm.xlu1 %4025, %v1574_v57   ;;  %v2971_v37 = vrot.slane %v2963_v17, %v4551_v52  ;;  %v1577_v28 = vcombine.low %v946_v26, %v950_v31  ;;  %v2401_v14 = vrot.slane %v4647_v9, %v4520_v2  ;;  %v2405_v59 = vrot.slane %v4647_v9, %v4523_v21 }
 0x1a9   : > { %v2978_v47 = vrot.slane %v2964_v8, %v4551_v52  ;;  %v1578_v35 = vcombine.low %v954_v38, %v958_v53  ;;  %v1585_v7 = vrot.slane %v1575_v54, %v4551_v52  ;;  %v1592_v18 = vrot.slane %v1576_v61, %v4551_v52 }
 0x1aa   : > { %v1599_v3 = vrot.slane %v1577_v28, %v4551_v52  ;;  %v2409_v50 = vrot.slane %v4647_v9, %v4526_v22  ;;  %v2413_v12 = vrot.slane %v4647_v9, %v4531_v41  ;;  %v2417_v46 = vrot.slane %v4647_v9, %v4534_v32 }
 0x1ab   : > { %v2979_v1 = vcombine.low %v2971_v37, %v2978_v47  ;;  %v1606_v0 = vrot.slane %v1578_v35, %v4551_v52  ;;  %v1607_v40 = vcombine.low %v1585_v7, %v1592_v18  ;;  %v2421_v4 = vrot.slane %v4647_v9, %v4537_v44 }
 0x1ac   : > { %v2425_v49 = vrot.slane %v4647_v9, %v4540_v45  ;;  %v2429_v39 = vrot.slane %v4647_v9, %v4548_v51  ;;  %v3029_v11 = vcombine.low %v2401_v14, %v2405_v59  ;;  %v3030_v16 = vcombine.low %v2409_v50, %v2413_v12 }
 0x1ad   : > { %3486 = vperm.xlu0 %4024, %v2979_v1   ;;  %v1608_v29 = vcombine.low %v1599_v3, %v1606_v0  ;;  %v1615_v34 = vrot.slane %v1607_v40, %v4551_v52  ;;  %v3031_v26 = vcombine.low %v2417_v46, %v2421_v4  ;;  %v994_v57 = vrot.slane %v4702_v60, %v4520_v2 }
 0x1ae   : > { %v3032_v17 = vcombine.low %v2425_v49, %v2429_v39  ;;  %v3039_v31 = vrot.slane %v3029_v11, %v4551_v52  ;;  %v3046_v38 = vrot.slane %v3030_v16, %v4551_v52  ;;  %v998_v8 = vrot.slane %v4702_v60, %v4523_v21 }
 0x1af   : > { %v1622_v9 = vrot.slane %v1608_v29, %v4551_v52  ;;  %v3053_v53 = vrot.slane %v3031_v26, %v4551_v52  ;;  %v1002_v54 = vrot.slane %v4702_v60, %v4526_v22  ;;  %v1006_v61 = vrot.slane %v4702_v60, %v4531_v41 }
 0x1b0   : > { %v3060_v37 = vrot.slane %v3032_v17, %v4551_v52  ;;  %v3061_v28 = vcombine.low %v3039_v31, %v3046_v38  ;;  %v1010_v14 = vrot.slane %v4702_v60, %v4534_v32  ;;  %v1014_v59 = vrot.slane %v4702_v60, %v4537_v44 }
 0x1b1   : > { %v1623_v47 = vcombine.low %v1615_v34, %v1622_v9  ;;  %v1018_v35 = vrot.slane %v4702_v60, %v4540_v45  ;;  %v1022_v7 = vrot.slane %v4702_v60, %v4548_v51  ;;  %v1673_v18 = vcombine.low %v994_v57, %v998_v8 }
 0x1b2   : > { %v3062_v3 = vcombine.low %v3053_v53, %v3060_v37  ;;  %v3069_v50 = vrot.slane %v3061_v28, %v4551_v52  ;;  %v1674_v12 = vcombine.low %v1002_v54, %v1006_v61  ;;  %v1675_v46 = vcombine.low %v1010_v14, %v1014_v59 }
 0x1b3   : > { %1992 = vperm.xlu1 %4025, %v1623_v47   ;;  %v1676_v1 = vcombine.low %v1018_v35, %v1022_v7  ;;  %v1683_v0 = vrot.slane %v1673_v18, %v4551_v52  ;;  %v2465_v40 = vrot.slane %v4669_v43, %v4520_v2  ;;  %v2469_v4 = vrot.slane %v4669_v43, %v4523_v21 }
 0x1b4   : > { %v3076_v49 = vrot.slane %v3062_v3, %v4551_v52  ;;  %v1690_v60 = vrot.slane %v1674_v12, %v4551_v52  ;;  %v1697_v39 = vrot.slane %v1675_v46, %v4551_v52  ;;  %v2473_v11 = vrot.slane %v4669_v43, %v4526_v22 }
 0x1b5   : > { %v1704_v16 = vrot.slane %v1676_v1, %v4551_v52  ;;  %v2477_v29 = vrot.slane %v4669_v43, %v4531_v41  ;;  %v2481_v34 = vrot.slane %v4669_v43, %v4534_v32  ;;  %v2485_v26 = vrot.slane %v4669_v43, %v4537_v44 }
 0x1b6   : > { %v3077_v57 = vcombine.low %v3069_v50, %v3076_v49  ;;  %v1705_v17 = vcombine.low %v1683_v0, %v1690_v60  ;;  %v2489_v31 = vrot.slane %v4669_v43, %v4540_v45  ;;  %v2493_v38 = vrot.slane %v4669_v43, %v4548_v51 }
 0x1b7   : > { %v1706_v8 = vcombine.low %v1697_v39, %v1704_v16  ;;  %v3127_v9 = vcombine.low %v2465_v40, %v2469_v4  ;;  %v3128_v53 = vcombine.low %v2473_v11, %v2477_v29  ;;  %v3129_v54 = vcombine.low %v2481_v34, %v2485_v26 }
 0x1b8   : > { %3492 = vperm.xlu0 %4024, %v3077_v57   ;;  %v1713_v61 = vrot.slane %v1705_v17, %v4551_v52  ;;  %v3130_v37 = vcombine.low %v2489_v31, %v2493_v38  ;;  %v1026_v28 = vrot.slane %v4697_v25, %v4520_v2  ;;  %v1030_v14 = vrot.slane %v4697_v25, %v4523_v21 }
 0x1b9   : > { %v1720_v59 = vrot.slane %v1706_v8, %v4551_v52  ;;  %v3137_v47 = vrot.slane %v3127_v9, %v4551_v52  ;;  %v3144_v43 = vrot.slane %v3128_v53, %v4551_v52  ;;  %v3151_v35 = vrot.slane %v3129_v54, %v4551_v52 }
 0x1ba   : > { %v3158_v7 = vrot.slane %v3130_v37, %v4551_v52  ;;  %v1034_v18 = vrot.slane %v4697_v25, %v4526_v22  ;;  %v1038_v3 = vrot.slane %v4697_v25, %v4531_v41  ;;  %v1042_v50 = vrot.slane %v4697_v25, %v4534_v32 }
 0x1bb   : > { %v1721_v12 = vcombine.low %v1713_v61, %v1720_v59  ;;  %v3159_v46 = vcombine.low %v3137_v47, %v3144_v43  ;;  %v1046_v1 = vrot.slane %v4697_v25, %v4537_v44  ;;  %v1050_v0 = vrot.slane %v4697_v25, %v4540_v45 }
 0x1bc   : > { %v3160_v40 = vcombine.low %v3151_v35, %v3158_v7  ;;  %v1054_v4 = vrot.slane %v4697_v25, %v4548_v51  ;;  %v1722_v49 = vcombine.low %v1026_v28, %v1030_v14  ;;  %v1723_v60 = vcombine.low %v1034_v18, %v1038_v3 }
 0x1bd   : > { %1998 = vperm.xlu1 %4025, %v1721_v12   ;;  %v3167_v39 = vrot.slane %v3159_v46, %v4551_v52  ;;  %v1724_v11 = vcombine.low %v1042_v50, %v1046_v1  ;;  %v2497_v16 = vrot.slane %v4714_v20, %v4520_v2  ;;  %v2501_v29 = vrot.slane %v4714_v20, %v4523_v21 }
 0x1be   : > { %v3174_v34 = vrot.slane %v3160_v40, %v4551_v52  ;;  %v1725_v26 = vcombine.low %v1050_v0, %v1054_v4  ;;  %v1732_v57 = vrot.slane %v1722_v49, %v4551_v52  ;;  %v1739_v17 = vrot.slane %v1723_v60, %v4551_v52 }
 0x1bf   : > { %v1746_v25 = vrot.slane %v1724_v11, %v4551_v52  ;;  %v2505_v31 = vrot.slane %v4714_v20, %v4526_v22  ;;  %v2509_v38 = vrot.slane %v4714_v20, %v4531_v41  ;;  %v2513_v8 = vrot.slane %v4714_v20, %v4534_v32 }
 0x1c0   : > { %v3175_v9 = vcombine.low %v3167_v39, %v3174_v34  ;;  %v1753_v53 = vrot.slane %v1725_v26, %v4551_v52  ;;  %v1754_v54 = vcombine.low %v1732_v57, %v1739_v17  ;;  %v2517_v61 = vrot.slane %v4714_v20, %v4537_v44 }
 0x1c1   : > { %v2521_v37 = vrot.slane %v4714_v20, %v4540_v45  ;;  %v2525_v28 = vrot.slane %v4714_v20, %v4548_v51  ;;  %v3176_v14 = vcombine.low %v2497_v16, %v2501_v29  ;;  %v3177_v59 = vcombine.low %v2505_v31, %v2509_v38 }
 0x1c2   : > { %3498 = vperm.xlu0 %4024, %v3175_v9   ;;  %v1755_v47 = vcombine.low %v1746_v25, %v1753_v53  ;;  %v1762_v43 = vrot.slane %v1754_v54, %v4551_v52  ;;  %v3178_v35 = vcombine.low %v2513_v8, %v2517_v61  ;;  %v1058_v7 = vrot.slane %v4742_v23, %v4520_v2 }
 0x1c3   : > { %v3179_v18 = vcombine.low %v2521_v37, %v2525_v28  ;;  %v3186_v3 = vrot.slane %v3176_v14, %v4551_v52  ;;  %v3193_v50 = vrot.slane %v3177_v59, %v4551_v52  ;;  %v1062_v12 = vrot.slane %v4742_v23, %v4523_v21 }
 0x1c4   : > { %v1769_v20 = vrot.slane %v1755_v47, %v4551_v52  ;;  %v3200_v46 = vrot.slane %v3178_v35, %v4551_v52  ;;  %v1066_v1 = vrot.slane %v4742_v23, %v4526_v22  ;;  %v1070_v0 = vrot.slane %v4742_v23, %v4531_v41 }
 0x1c5   : > { %v3207_v40 = vrot.slane %v3179_v18, %v4551_v52  ;;  %v3208_v4 = vcombine.low %v3186_v3, %v3193_v50  ;;  %v1074_v49 = vrot.slane %v4742_v23, %v4534_v32  ;;  %v1078_v60 = vrot.slane %v4742_v23, %v4537_v44 }
 0x1c6   : > { %v1770_v39 = vcombine.low %v1762_v43, %v1769_v20  ;;  %v1082_v11 = vrot.slane %v4742_v23, %v4540_v45  ;;  %v1086_v16 = vrot.slane %v4742_v23, %v4548_v51  ;;  %v1771_v29 = vcombine.low %v1058_v7, %v1062_v12 }
 0x1c7   : > { %v3209_v34 = vcombine.low %v3200_v46, %v3207_v40  ;;  %v3216_v26 = vrot.slane %v3208_v4, %v4551_v52  ;;  %v1772_v57 = vcombine.low %v1066_v1, %v1070_v0  ;;  %v1773_v17 = vcombine.low %v1074_v49, %v1078_v60 }
 0x1c8   : > { %2001 = vperm.xlu1 %4025, %v1770_v39   ;;  %v1774_v25 = vcombine.low %v1082_v11, %v1086_v16  ;;  %v1781_v31 = vrot.slane %v1771_v29, %v4551_v52  ;;  %v2529_v38 = vrot.slane %v4712_v58, %v4520_v2  ;;  %v2533_v8 = vrot.slane %v4712_v58, %v4523_v21 }
 0x1c9   : > { %v3223_v9 = vrot.slane %v3209_v34, %v4551_v52  ;;  %v1788_v23 = vrot.slane %v1772_v57, %v4551_v52  ;;  %v1795_v53 = vrot.slane %v1773_v17, %v4551_v52  ;;  %v2537_v54 = vrot.slane %v4712_v58, %v4526_v22 }
 0x1ca   : > { %v1802_v61 = vrot.slane %v1774_v25, %v4551_v52  ;;  %v2541_v37 = vrot.slane %v4712_v58, %v4531_v41  ;;  %v2545_v28 = vrot.slane %v4712_v58, %v4534_v32  ;;  %v2549_v14 = vrot.slane %v4712_v58, %v4537_v44 }
 0x1cb   : > { %v3224_v59 = vcombine.low %v3216_v26, %v3223_v9  ;;  %v1803_v47 = vcombine.low %v1781_v31, %v1788_v23  ;;  %v2553_v43 = vrot.slane %v4712_v58, %v4540_v45  ;;  %v2557_v35 = vrot.slane %v4712_v58, %v4548_v51 }
 0x1cc   : > { %v1804_v7 = vcombine.low %v1795_v53, %v1802_v61  ;;  %v3225_v18 = vcombine.low %v2529_v38, %v2533_v8  ;;  %v3226_v3 = vcombine.low %v2537_v54, %v2541_v37  ;;  %v3227_v50 = vcombine.low %v2545_v28, %v2549_v14 }
 0x1cd   : > { %3501 = vperm.xlu0 %4024, %v3224_v59   ;;  %v1811_v12 = vrot.slane %v1803_v47, %v4551_v52  ;;  %v3228_v20 = vcombine.low %v2553_v43, %v2557_v35  ;;  %v1090_v46 = vrot.slane %v4737_v5, %v4520_v2  ;;  %v1094_v1 = vrot.slane %v4737_v5, %v4523_v21 }
 0x1ce   : > { %v1818_v0 = vrot.slane %v1804_v7, %v4551_v52  ;;  %v3235_v40 = vrot.slane %v3225_v18, %v4551_v52  ;;  %v3242_v58 = vrot.slane %v3226_v3, %v4551_v52  ;;  %v3249_v4 = vrot.slane %v3227_v50, %v4551_v52 }
 0x1cf   : > { %v3256_v49 = vrot.slane %v3228_v20, %v4551_v52  ;;  %v1098_v60 = vrot.slane %v4737_v5, %v4526_v22  ;;  %v1102_v39 = vrot.slane %v4737_v5, %v4531_v41  ;;  %v1106_v11 = vrot.slane %v4737_v5, %v4534_v32 }
 0x1d0   : > { %v1819_v16 = vcombine.low %v1811_v12, %v1818_v0  ;;  %v3257_v29 = vcombine.low %v3235_v40, %v3242_v58  ;;  %v1110_v34 = vrot.slane %v4737_v5, %v4537_v44  ;;  %v1114_v26 = vrot.slane %v4737_v5, %v4540_v45 }
 0x1d1   : > { %v3258_v57 = vcombine.low %v3249_v4, %v3256_v49  ;;  %v1118_v17 = vrot.slane %v4737_v5, %v4548_v51  ;;  %v1820_v25 = vcombine.low %v1090_v46, %v1094_v1  ;;  %v1821_v31 = vcombine.low %v1098_v60, %v1102_v39 }
 0x1d2   : > { %2004 = vperm.xlu1 %4025, %v1819_v16   ;;  %v3265_v38 = vrot.slane %v3257_v29, %v4551_v52  ;;  %v1822_v8 = vcombine.low %v1106_v11, %v1110_v34  ;;  %v2177_v9 = vrot.slane %v4563_v6, %v4520_v2  ;;  %v2181_v23 = vrot.slane %v4563_v6, %v4523_v21 }
 0x1d3   : > { %v3272_v53 = vrot.slane %v3258_v57, %v4551_v52  ;;  %v1823_v54 = vcombine.low %v1114_v26, %v1118_v17  ;;  %v1830_v61 = vrot.slane %v1820_v25, %v4551_v52  ;;  %v1837_v37 = vrot.slane %v1821_v31, %v4551_v52 }
 0x1d4   : > { %v1844_v5 = vrot.slane %v1822_v8, %v4551_v52  ;;  %v2185_v28 = vrot.slane %v4563_v6, %v4526_v22  ;;  %v2189_v14 = vrot.slane %v4563_v6, %v4531_v41  ;;  %v2193_v59 = vrot.slane %v4563_v6, %v4534_v32 }
 0x1d5   : > { %v3273_v47 = vcombine.low %v3265_v38, %v3272_v53  ;;  %v1851_v43 = vrot.slane %v1823_v54, %v4551_v52  ;;  %v1852_v35 = vcombine.low %v1830_v61, %v1837_v37  ;;  %v2197_v7 = vrot.slane %v4563_v6, %v4537_v44 }
 0x1d6   : > { %v2201_v18 = vrot.slane %v4563_v6, %v4540_v45  ;;  %v2205_v3 = vrot.slane %v4563_v6, %v4548_v51  ;;  %v2686_v50 = vcombine.low %v2177_v9, %v2181_v23  ;;  %v2687_v12 = vcombine.low %v2185_v28, %v2189_v14 }
 0x1d7   : > { %3504 = vperm.xlu0 %4024, %v3273_v47   ;;  %v1853_v20 = vcombine.low %v1844_v5, %v1851_v43  ;;  %v1860_v46 = vrot.slane %v1852_v35, %v4551_v52  ;;  %v2688_v1 = vcombine.low %v2193_v59, %v2197_v7  ;;  %v2561_v0 = vrot.slane %v4754_v19, %v4520_v2 }
 0x1d8   : > { %v2689_v40 = vcombine.low %v2201_v18, %v2205_v3  ;;  %v2696_v58 = vrot.slane %v2686_v50, %v4551_v52  ;;  %v2703_v4 = vrot.slane %v2687_v12, %v4551_v52  ;;  %v2565_v49 = vrot.slane %v4754_v19, %v4523_v21 }
 0x1d9   : > { %v1867_v6 = vrot.slane %v1853_v20, %v4551_v52  ;;  %v2710_v60 = vrot.slane %v2688_v1, %v4551_v52  ;;  %v2569_v39 = vrot.slane %v4754_v19, %v4526_v22  ;;  %v2573_v11 = vrot.slane %v4754_v19, %v4531_v41 }
 0x1da   : > { %v2717_v16 = vrot.slane %v2689_v40, %v4551_v52  ;;  %v2718_v29 = vcombine.low %v2696_v58, %v2703_v4  ;;  %v2577_v34 = vrot.slane %v4754_v19, %v4534_v32  ;;  %v2581_v26 = vrot.slane %v4754_v19, %v4537_v44 }
 0x1db   : > { %v1868_v57 = vcombine.low %v1860_v46, %v1867_v6  ;;  %v2585_v17 = vrot.slane %v4754_v19, %v4540_v45  ;;  %v2589_v25 = vrot.slane %v4754_v19, %v4548_v51  ;;  %v3274_v31 = vcombine.low %v2561_v0, %v2565_v49 }
 0x1dc   : > { %v2719_v38 = vcombine.low %v2710_v60, %v2717_v16  ;;  %v2726_v8 = vrot.slane %v2718_v29, %v4551_v52  ;;  %v3275_v9 = vcombine.low %v2569_v39, %v2573_v11  ;;  %v3276_v23 = vcombine.low %v2577_v34, %v2581_v26 }
 0x1dd   : > { %2007 = vperm.xlu1 %4025, %v1868_v57   ;;  %v3277_v53 = vcombine.low %v2585_v17, %v2589_v25  ;;  %v3284_v54 = vrot.slane %v3274_v31, %v4551_v52  ;;  %v2241_v61 = vrot.slane %v4612_v13, %v4520_v2  ;;  %v2245_v37 = vrot.slane %v4612_v13, %v4523_v21 }
 0x1de   : > { %v2733_v5 = vrot.slane %v2719_v38, %v4551_v52  ;;  %v3291_v19 = vrot.slane %v3275_v9, %v4551_v52  ;;  %v3298_v28 = vrot.slane %v3276_v23, %v4551_v52  ;;  %v2249_v14 = vrot.slane %v4612_v13, %v4526_v22 }
 0x1df   : > { %v3305_v59 = vrot.slane %v3277_v53, %v4551_v52  ;;  %v2253_v47 = vrot.slane %v4612_v13, %v4531_v41  ;;  %v2257_v43 = vrot.slane %v4612_v13, %v4534_v32  ;;  %v2261_v35 = vrot.slane %v4612_v13, %v4537_v44 }
 0x1e0   : > { %v2734_v7 = vcombine.low %v2726_v8, %v2733_v5  ;;  %v3306_v18 = vcombine.low %v3284_v54, %v3291_v19  ;;  %v2265_v3 = vrot.slane %v4612_v13, %v4540_v45  ;;  %v2269_v50 = vrot.slane %v4612_v13, %v4548_v51 }
 0x1e1   : > { %v3307_v12 = vcombine.low %v3298_v28, %v3305_v59  ;;  %v2784_v20 = vcombine.low %v2241_v61, %v2245_v37  ;;  %v2785_v46 = vcombine.low %v2249_v14, %v2253_v47  ;;  %v2786_v1 = vcombine.low %v2257_v43, %v2261_v35 }
 0x1e2   : > { %3471 = vperm.xlu1 %4025, %v2734_v7   ;;  %v3314_v0 = vrot.slane %v3306_v18, %v4551_v52  ;;  %v2787_v40 = vcombine.low %v2265_v3, %v2269_v50  ;;  %v2593_v58 = vrot.slane %v4752_v63, %v4520_v2  ;;  %v2597_v4 = vrot.slane %v4752_v63, %v4523_v21 }
 0x1e3   : > { %v3321_v49 = vrot.slane %v3307_v12, %v4551_v52  ;;  %v2794_v6 = vrot.slane %v2784_v20, %v4551_v52  ;;  %v2801_v13 = vrot.slane %v2785_v46, %v4551_v52  ;;  %v2808_v60 = vrot.slane %v2786_v1, %v4551_v52 }
 0x1e4   : > { %v2815_v39 = vrot.slane %v2787_v40, %v4551_v52  ;;  %v2601_v11 = vrot.slane %v4752_v63, %v4526_v22  ;;  %v2605_v16 = vrot.slane %v4752_v63, %v4531_v41  ;;  %v2609_v29 = vrot.slane %v4752_v63, %v4534_v32 }
 0x1e5   : > { %v3322_v34 = vcombine.low %v3314_v0, %v3321_v49  ;;  %v2816_v26 = vcombine.low %v2794_v6, %v2801_v13  ;;  %v2613_v57 = vrot.slane %v4752_v63, %v4537_v44  ;;  %v2617_v17 = vrot.slane %v4752_v63, %v4540_v45 }
 0x1e6   : > { %v2817_v25 = vcombine.low %v2808_v60, %v2815_v39  ;;  %v2621_v31 = vrot.slane %v4752_v63, %v4548_v51  ;;  %v3323_v38 = vcombine.low %v2593_v58, %v2597_v4  ;;  %v3324_v8 = vcombine.low %v2601_v11, %v2605_v16 }
 0x1e7   : > { %3507 = vperm.xlu0 %4024, %v3322_v34   ;;  %v2824_v9 = vrot.slane %v2816_v26, %v4551_v52  ;;  %v3325_v23 = vcombine.low %v2609_v29, %v2613_v57  ;;  %v2305_v53 = vrot.slane %v4635_v42, %v4520_v2  ;;  %v2309_v54 = vrot.slane %v4635_v42, %v4523_v21 }
 0x1e8   : > { %v2831_v61 = vrot.slane %v2817_v25, %v4551_v52  ;;  %v3326_v37 = vcombine.low %v2617_v17, %v2621_v31  ;;  %v3333_v5 = vrot.slane %v3323_v38, %v4551_v52  ;;  %v3340_v19 = vrot.slane %v3324_v8, %v4551_v52 }
 0x1e9   : > { %v3347_v63 = vrot.slane %v3325_v23, %v4551_v52  ;;  %v2313_v28 = vrot.slane %v4635_v42, %v4526_v22  ;;  %v2317_v14 = vrot.slane %v4635_v42, %v4531_v41  ;;  %v2321_v59 = vrot.slane %v4635_v42, %v4534_v32 }
 0x1ea   : > { %v2832_v47 = vcombine.low %v2824_v9, %v2831_v61  ;;  %v3354_v43 = vrot.slane %v3326_v37, %v4551_v52  ;;  %v3355_v35 = vcombine.low %v3333_v5, %v3340_v19  ;;  %v2325_v7 = vrot.slane %v4635_v42, %v4537_v44 }
 0x1eb   : > { %v2329_v18 = vrot.slane %v4635_v42, %v4540_v45  ;;  %v2333_v3 = vrot.slane %v4635_v42, %v4548_v51  ;;  %v2882_v50 = vcombine.low %v2305_v53, %v2309_v54  ;;  %v2883_v12 = vcombine.low %v2313_v28, %v2317_v14 }
 0x1ec   : > { %3477 = vperm.xlu1 %4025, %v2832_v47   ;;  %v3356_v20 = vcombine.low %v3347_v63, %v3354_v43  ;;  %v3363_v46 = vrot.slane %v3355_v35, %v4551_v52  ;;  %v2884_v1 = vcombine.low %v2321_v59, %v2325_v7  ;;  %v2625_v0 = vrot.slane %v4802_v62, %v4520_v2 }
 0x1ed   : > { %v2885_v40 = vcombine.low %v2329_v18, %v2333_v3  ;;  %v2892_v58 = vrot.slane %v2882_v50, %v4551_v52  ;;  %v2899_v4 = vrot.slane %v2883_v12, %v4551_v52  ;;  %v2629_v49 = vrot.slane %v4802_v62, %v4523_v21 }
 0x1ee   : > { %v3370_v42 = vrot.slane %v3356_v20, %v4551_v52  ;;  %v2906_v6 = vrot.slane %v2884_v1, %v4551_v52  ;;  %v2633_v13 = vrot.slane %v4802_v62, %v4526_v22  ;;  %v2637_v60 = vrot.slane %v4802_v62, %v4531_v41 }
 0x1ef   : > { %v2913_v39 = vrot.slane %v2885_v40, %v4551_v52  ;;  %v2914_v11 = vcombine.low %v2892_v58, %v2899_v4  ;;  %v2641_v16 = vrot.slane %v4802_v62, %v4534_v32  ;;  %v2645_v29 = vrot.slane %v4802_v62, %v4537_v44 }
 0x1f0   : > { %v3371_v34 = vcombine.low %v3363_v46, %v3370_v42  ;;  %v2649_v26 = vrot.slane %v4802_v62, %v4540_v45  ;;  %v2653_v57 = vrot.slane %v4802_v62, %v4548_v51  ;;  %v3372_v17 = vcombine.low %v2625_v0, %v2629_v49 }
 0x1f1   : > { %v2915_v25 = vcombine.low %v2906_v6, %v2913_v39  ;;  %v2922_v31 = vrot.slane %v2914_v11, %v4551_v52  ;;  %v3373_v38 = vcombine.low %v2633_v13, %v2637_v60  ;;  %v3374_v8 = vcombine.low %v2641_v16, %v2645_v29 }
 0x1f2   : > { %3510 = vperm.xlu0 %4024, %v3371_v34   ;;  %v3375_v9 = vcombine.low %v2649_v26, %v2653_v57  ;;  %v3382_v23 = vrot.slane %v3372_v17, %v4551_v52  ;;  %v2369_v53 = vrot.slane %v4658_v56, %v4520_v2  ;;  %v2373_v54 = vrot.slane %v4658_v56, %v4523_v21 }
 0x1f3   : > { %v2929_v61 = vrot.slane %v2915_v25, %v4551_v52  ;;  %v3389_v62 = vrot.slane %v3373_v38, %v4551_v52  ;;  %v3396_v37 = vrot.slane %v3374_v8, %v4551_v52  ;;  %v2377_v5 = vrot.slane %v4658_v56, %v4526_v22 }
 0x1f4   : > { %v3403_v19 = vrot.slane %v3375_v9, %v4551_v52  ;;  %v2381_v63 = vrot.slane %v4658_v56, %v4531_v41  ;;  %v2385_v28 = vrot.slane %v4658_v56, %v4534_v32  ;;  %v2389_v14 = vrot.slane %v4658_v56, %v4537_v44 }
 0x1f5   : > { %v2930_v59 = vcombine.low %v2922_v31, %v2929_v61  ;;  %v3404_v47 = vcombine.low %v3382_v23, %v3389_v62  ;;  %v2393_v43 = vrot.slane %v4658_v56, %v4540_v45  ;;  %v2397_v35 = vrot.slane %v4658_v56, %v4548_v51  ;;  %v5353_v62 = vpop.permute.xlu1 %1971 }
 0x1f6   : > { %v3405_v7 = vcombine.low %v3396_v37, %v3403_v19  ;;  %v2980_v18 = vcombine.low %v2369_v53, %v2373_v54  ;;  %v2981_v3 = vcombine.low %v2377_v5, %v2381_v63  ;;  %v2982_v50 = vcombine.low %v2385_v28, %v2389_v14 }
 0x1f7   : > { %3483 = vperm.xlu1 %4025, %v2930_v59   ;;  %v3412_v12 = vrot.slane %v3404_v47, %v4551_v52  ;;  %v2983_v20 = vcombine.low %v2393_v43, %v2397_v35  ;;  %v2657_v46 = vrot.slane %v4800_v10, %v4520_v2  ;;  %v2661_v1 = vrot.slane %v4800_v10, %v4523_v21 }
 0x1f8   : > { %v3419_v0 = vrot.slane %v3405_v7, %v4551_v52  ;;  %v2990_v40 = vrot.slane %v2980_v18, %v4551_v52  ;;  %v2997_v56 = vrot.slane %v2981_v3, %v4551_v52  ;;  %v3004_v58 = vrot.slane %v2982_v50, %v4551_v52 }
 0x1f9   : > { %v3011_v4 = vrot.slane %v2983_v20, %v4551_v52  ;;  %v2665_v49 = vrot.slane %v4800_v10, %v4526_v22  ;;  %v2669_v42 = vrot.slane %v4800_v10, %v4531_v41  ;;  %v2673_v6 = vrot.slane %v4800_v10, %v4534_v32 }
 0x1fa   : > { %v3420_v13 = vcombine.low %v3412_v12, %v3419_v0  ;;  %v3012_v60 = vcombine.low %v2990_v40, %v2997_v56  ;;  %v2677_v39 = vrot.slane %v4800_v10, %v4537_v44  ;;  %v2681_v11 = vrot.slane %v4800_v10, %v4540_v45 }
 0x1fb   : > { %v3013_v16 = vcombine.low %v3004_v58, %v3011_v4  ;;  %v2685_v29 = vrot.slane %v4800_v10, %v4548_v51  ;;  %v3421_v34 = vcombine.low %v2657_v46, %v2661_v1  ;;  %v3422_v26 = vcombine.low %v2665_v49, %v2669_v42  ;;  %v5380_v49 = vpop.permute.xlu1 %1974 }
 0x1fc   : > { %3513 = vperm.xlu0 %4024, %v3420_v13   ;;  %v3020_v57 = vrot.slane %v3012_v60, %v4551_v52  ;;  %v3423_v17 = vcombine.low %v2673_v6, %v2677_v39  ;;  %v2433_v25 = vrot.slane %v4682_v15, %v4520_v2  ;;  %v2437_v31 = vrot.slane %v4682_v15, %v4523_v21 }
 0x1fd   : > { %v3027_v38 = vrot.slane %v3013_v16, %v4551_v52  ;;  %v3424_v8 = vcombine.low %v2681_v11, %v2685_v29  ;;  %v3431_v9 = vrot.slane %v3421_v34, %v4551_v52  ;;  %v3438_v23 = vrot.slane %v3422_v26, %v4551_v52 }
 0x1fe   : > { %v3445_v10 = vrot.slane %v3423_v17, %v4551_v52  ;;  %v2441_v53 = vrot.slane %v4682_v15, %v4526_v22  ;;  %v2445_v54 = vrot.slane %v4682_v15, %v4531_v41  ;;  %v2449_v61 = vrot.slane %v4682_v15, %v4534_v32 }
 0x1ff   : > { %v3028_v37 = vcombine.low %v3020_v57, %v3027_v38  ;;  %v3452_v5 = vrot.slane %v3424_v8, %v4551_v52  ;;  %v3453_v19 = vcombine.low %v3431_v9, %v3438_v23  ;;  %v2453_v63 = vrot.slane %v4682_v15, %v4537_v44 }
 0x200   : > { %v2457_v28 = vrot.slane %v4682_v15, %v4540_v45  ;;  %v2461_v14 = vrot.slane %v4682_v15, %v4548_v51  ;;  %v3078_v59 = vcombine.low %v2433_v25, %v2437_v31  ;;  %v3079_v47 = vcombine.low %v2441_v53, %v2445_v54 }
 0x201   : > { %3489 = vperm.xlu1 %4025, %v3028_v37   ;;  %v3454_v43 = vcombine.low %v3445_v10, %v3452_v5  ;;  %v3461_v35 = vrot.slane %v3453_v19, %v4551_v52  ;;  %v3080_v7 = vcombine.low %v2449_v61, %v2453_v63  ;;  %v1122_v18 = vrot.slane %v4786_v48, %v4520_v2 }
 0x202   : > { %v3081_v3 = vcombine.low %v2457_v28, %v2461_v14  ;;  %v3088_v50 = vrot.slane %v3078_v59, %v4551_v52  ;;  %v3095_v12 = vrot.slane %v3079_v47, %v4551_v52  ;;  %v1126_v20 = vrot.slane %v4786_v48, %v4523_v21  ;;  %v1969_v47 = vpop.permute.xlu0 %1968 }
 0x203   : > { %v3468_v15 = vrot.slane %v3454_v43, %v4551_v52  ;;  %v3102_v46 = vrot.slane %v3080_v7, %v4551_v52  ;;  %v1130_v1 = vrot.slane %v4786_v48, %v4526_v22  ;;  %v1134_v0 = vrot.slane %v4786_v48, %v4531_v41 }
 0x204   : > { %v3109_v40 = vrot.slane %v3081_v3, %v4551_v52  ;;  %v3110_v56 = vcombine.low %v3088_v50, %v3095_v12  ;;  %v1138_v58 = vrot.slane %v4786_v48, %v4534_v32  ;;  %v1142_v4 = vrot.slane %v4786_v48, %v4537_v44 }
 0x205   : > { %v3469_v42 = vcombine.low %v3461_v35, %v3468_v15  ;;  %v1146_v6 = vrot.slane %v4786_v48, %v4540_v45  ;;  %v1150_v13 = vrot.slane %v4786_v48, %v4548_v51  ;;  %v1869_v60 = vcombine.low %v1122_v18, %v1126_v20 }
 0x206   : > { %v3111_v39 = vcombine.low %v3102_v46, %v3109_v40  ;;  %v3118_v11 = vrot.slane %v3110_v56, %v4551_v52  ;;  %v1870_v16 = vcombine.low %v1130_v1, %v1134_v0  ;;  %v1871_v29 = vcombine.low %v1138_v58, %v1142_v4 }
 0x207   : > { %3516 = vperm.xlu0 %4024, %v3469_v42   ;;  %v1872_v34 = vcombine.low %v1146_v6, %v1150_v13  ;;  %v1879_v26 = vrot.slane %v1869_v60, %v4551_v52  ;;  %v1154_v57 = vrot.slane %v4781_v36, %v4520_v2  ;;  %v1158_v17 = vrot.slane %v4781_v36, %v4523_v21 }
 0x208   : > { %v3125_v25 = vrot.slane %v3111_v39, %v4551_v52  ;;  %v1886_v48 = vrot.slane %v1870_v16, %v4551_v52  ;;  %v1893_v31 = vrot.slane %v1871_v29, %v4551_v52  ;;  %v1162_v38 = vrot.slane %v4781_v36, %v4526_v22  ;;  %v1978_v22 = vpop.permute.xlu1 %1977  ;;  %v5723_v29 = vld [vmem:[#allocation15_spill] sm:$0xff] }
 0x209   : > { %v1900_v8 = vrot.slane %v1872_v34, %v4551_v52  ;;  %v1166_v9 = vrot.slane %v4781_v36, %v4531_v41  ;;  %v1170_v2 = vrot.slane %v4781_v36, %v4534_v32  ;;  %v1174_v21 = vrot.slane %v4781_v36, %v4537_v44 }
 0x20a   : > { %v3126_v23 = vcombine.low %v3118_v11, %v3125_v25  ;;  %v1901_v10 = vcombine.low %v1879_v26, %v1886_v48  ;;  %v1178_v53 = vrot.slane %v4781_v36, %v4540_v45  ;;  %v1182_v54 = vrot.slane %v4781_v36, %v4548_v51 }
 0x20b   : > { %v1902_v61 = vcombine.low %v1893_v31, %v1900_v8  ;;  %v1918_v37 = vcombine.low %v1154_v57, %v1158_v17  ;;  %v1919_v5 = vcombine.low %v1162_v38, %v1166_v9  ;;  %v1920_v19 = vcombine.low %v1170_v2, %v1174_v21  ;;  %v5724_v38 = vld [vmem:[#allocation14_spill] sm:$0xff] }
 0x20c   : > { %3495 = vperm.xlu1 %4025, %v3126_v23   ;;  %v1909_v41 = vrot.slane %v1901_v10, %v4551_v52  ;;  %v1921_v32 = vcombine.low %v1178_v53, %v1182_v54  ;;  %v5722_v63 = vlaneseq  ;;  %v1981_v15 = vpop.permute.xlu1 %1980 }
 0x20d   : > { %v1916_v44 = vrot.slane %v1902_v61, %v4551_v52  ;;  %v1928_v14 = vrot.slane %v1918_v37, %v4551_v52  ;;  %v1935_v45 = vrot.slane %v1919_v5, %v4551_v52  ;;  %v1942_v51 = vrot.slane %v1920_v19, %v4551_v52  ;;  %v5725_v61 = vld [vmem:[#allocation17_spill] sm:$0xff] }
 0x20e   : > { %v5410_v28 = vand.u32 127, %v5722_v63  ;;  %v1949_v36 = vrot.slane %v1921_v32, %v4551_v52  ;;  %v5726_v32 = vld [vmem:[#allocation18_spill] sm:$0xff] }
 0x20f   : > { %v1917_v7 = vcombine.low %v1909_v41, %v1916_v44  ;;  %v1950_v18 = vcombine.low %v1928_v14, %v1935_v45 }
 0x210   : > { %v5419_v59 = vsub.s32 %v5410_v28, %v4517_v33  ;;  %v2021_v43 = vadd.s32 4294967288, %v5410_v28  ;;  %v2028_v35 = vadd.s32 4294967280, %v5410_v28  ;;  %v2035_v3 = vadd.s32 4294967272, %v5410_v28 }
 0x211   : > { %v1951_v50 = vcombine.low %v1942_v51, %v1949_v36  ;;  %2010 = vperm.xlu1 %4025, %v1917_v7   ;;  %v1958_v46 = vrot.slane %v1950_v18, %v4551_v52  ;;  %v2042_v4 = vadd.s32 4294967264, %v5410_v28  ;;  %v2077_v25 = vadd.s32 4294967224, %v5410_v28  ;;  %v5727_v51 = vld [vmem:[#allocation16_spill] sm:$0xff] }
 0x212   : > { %v3633_v12 = vrot.slane %v4528_v27, %v5419_v59  ;;  %v5427_v20 = vsub.s32 %v2021_v43, %v4517_v33  ;;  %v2020_v1 = vrot.slane %v1969_v47, %v5419_v59  ;;  %v5432_v0 = vsub.s32 %v2028_v35, %v4517_v33  ;;  %v1984_v57 = vpop.permute.xlu1 %1983  ;;  %v5728_v47 = vld [vmem:[#allocation19_spill] sm:$0xff] }
 0x213   : > { %v5435_v40 = vsub.s32 %v2035_v3, %v4517_v33  ;;  %v1965_v56 = vrot.slane %v1951_v50, %v4551_v52  ;;  %v2056_v48 = vadd.s32 4294967248, %v5410_v28  ;;  %v5472_v2 = vsub.s32 %v2077_v25, %v4517_v33 }
 0x214   : > { %v3637_v27 = vrot.slane %v4553_v55, %v5427_v20  ;;  %v2025_v58 = vrot.slane %v5353_v62, %v5427_v20  ;;  %v3642_v42 = vrot.slane %v4584_v30, %v5432_v0  ;;  %v2032_v6 = vrot.slane %v5380_v49, %v5432_v0 }
 0x215   : > { %v3647_v13 = vrot.slane %v4576_v24, %v5435_v40  ;;  %v2039_v60 = vrot.slane %v1978_v22, %v5435_v40  ;;  %v1966_v39 = vcombine.low %v1958_v46, %v1965_v56  ;;  %v5453_v62 = vsub.s32 %v2042_v4, %v4517_v33  ;;  %v5729_v46 = vld [vmem:[#allocation21_spill] sm:$0xff]  ;;  %v5730_v56 = vld [vmem:[#allocation20_spill] sm:$0xff] }
 0x216   : > { %v3638_v11 = vsel %vm2026_vm0, %v3637_v27, %v3633_v12  ;;  %v2027_v55 = vsel %vm2026_vm0, %v2025_v58, %v2020_v1  ;;  %v2049_v49 = vadd.s32 4294967256, %v5410_v28  ;;  %v5475_v21 = vsub.s32 %v2056_v48, %v4517_v33 }
 0x217   : > { %v3643_v16 = vsel %vm2033_vm1, %v3642_v42, %v3638_v11  ;;  %v2034_v30 = vsel %vm2033_vm1, %v2032_v6, %v2027_v55  ;;  %2013 = vperm.xlu1 %4025, %v1966_v39   ;;  %v3652_v34 = vrot.slane %v5723_v29, %v5453_v62  ;;  %v2046_v26 = vrot.slane %v1981_v15, %v5453_v62  ;;  %v5731_v39 = vld [vmem:[#allocation23_spill] sm:$0xff] }
 0x218   : > { %v2041_v24 = vsel %vm2040_vm2, %v2039_v60, %v2034_v30  ;;  %v5463_v17 = vsub.s32 %v2049_v49, %v4517_v33  ;;  %v3648_v31 = vsel %vm2040_vm2, %v3647_v13, %v3643_v16  ;;  %v2063_v53 = vadd.s32 4294967240, %v5410_v28  ;;  %v5732_v16 = vld [vmem:[#allocation22_spill] sm:$0xff] }
 0x219   : > { %v3653_v23 = vsel %vm2047_vm3, %v3652_v34, %v3648_v31  ;;  %v2048_v10 = vsel %vm2047_vm3, %v2046_v26, %v2041_v24  ;;  %v2070_v54 = vadd.s32 4294967232, %v5410_v28  ;;  %v3662_v37 = vrot.slane %v5725_v61, %v5475_v21  ;;  %v5733_v34 = vld [vmem:[#allocation25_spill] sm:$0xff] }
 0x21a   : > { %v3657_v8 = vrot.slane %v5724_v38, %v5463_v17  ;;  %v2053_v9 = vrot.slane %v1984_v57, %v5463_v17  ;;  %v5485_v5 = vsub.s32 %v2063_v53, %v4517_v33  ;;  %v3677_v63 = vrot.slane %v5726_v32, %v5472_v2  ;;  %v5734_v57 = vld [vmem:[#allocation24_spill] sm:$0xff] }
 0x21b   : > { %v5488_v19 = vsub.s32 %v2070_v54, %v4517_v33  ;;  %v2084_v44 = vadd.s32 4294967216, %v5410_v28  ;;  %v2091_v14 = vadd.s32 4294967208, %v5410_v28  ;;  %v2098_v18 = vadd.s32 4294967200, %v5410_v28 }
 0x21c   : > { %v2055_v22 = vsel %vm2054_vm4, %v2053_v9, %v2048_v10  ;;  %v3658_v41 = vsel %vm2054_vm4, %v3657_v8, %v3653_v23  ;;  %v3667_v36 = vrot.slane %v5727_v51, %v5485_v5  ;;  %v2105_v50 = vadd.s32 4294967192, %v5410_v28 }
 0x21d   : > { %v3663_v45 = vsel %vm2061_vm5, %v3662_v37, %v3658_v41  ;;  %v3672_v43 = vrot.slane %v5728_v47, %v5488_v19  ;;  %v5501_v35 = vsub.s32 %v2084_v44, %v4517_v33  ;;  %v5504_v7 = vsub.s32 %v2091_v14, %v4517_v33  ;;  %v1987_v12 = vpop.permute.xlu1 %1986 }
 0x21e   : > { %v3668_v3 = vsel %vm2068_vm6, %v3667_v36, %v3663_v45  ;;  %v5515_v58 = vsub.s32 %v2098_v18, %v4517_v33  ;;  %v5519_v42 = vsub.s32 %v2105_v50, %v4517_v33  ;;  %v2112_v6 = vadd.s32 4294967184, %v5410_v28 }
 0x21f   : > { %v3673_v15 = vsel %vm2075_vm7, %v3672_v43, %v3668_v3  ;;  %v3682_v1 = vrot.slane %v5729_v46, %v5501_v35  ;;  %v3687_v27 = vrot.slane %v5730_v56, %v5504_v7  ;;  %v2119_v13 = vadd.s32 4294967176, %v5410_v28 }
 0x220   : > { %v3678_v4 = vsel %vm2082_vm8, %v3677_v63, %v3673_v15  ;;  %v3692_v11 = vrot.slane %v5731_v39, %v5515_v58  ;;  %v3697_v30 = vrot.slane %v5732_v16, %v5519_v42  ;;  %v5530_v49 = vsub.s32 %v2112_v6, %v4517_v33 }
 0x221   : > { %v3683_v60 = vsel %vm2089_vm9, %v3682_v1, %v3678_v4  ;;  %v5533_v24 = vsub.s32 %v2119_v13, %v4517_v33  ;;  %v2060_v28 = vrot.slane %v1987_v12, %v5475_v21 }
 0x222   : > { %v3688_v55 = vsel %vm2096_vm10, %v3687_v27, %v3683_v60  ;;  %v3702_v26 = vrot.slane %v5733_v34, %v5530_v49 }
 0x223   : > { %v3693_v29 = vsel %vm2103_vm11, %v3692_v11, %v3688_v55  ;;  %v3707_v25 = vrot.slane %v5734_v57, %v5533_v24  ;;  %v2062_v8 = vsel %vm2061_vm5, %v2060_v28, %v2055_v22 }
 0x224   : > { %v3698_v33 = vsel %vm2110_vm12, %v3697_v30, %v3693_v29 }
 0x225   : > { %v3703_v38 = vsel %vm2117_vm13, %v3702_v26, %v3698_v33 }
 0x226   : > { %v3708_v9 = vsel %vm2124_vm14, %v3707_v25, %v3703_v38 }
 0x227   : > { %v1990_v48 = vpop.permute.xlu1 %1989  ;;  %3710 = vst [vmem:[%s281_s20] sm:$0x1] %v3708_v9 }
 0x228   : > { %v2067_v31 = vrot.slane %v1990_v48, %v5485_v5 }
 0x22a   : > { %v2069_v23 = vsel %vm2068_vm6, %v2067_v31, %v2062_v8 }
 0x22b   : > { %4127 = shalt.err (!%p4124_p10)
}
 0x22c   : > { %s4128_s13 = scalar_lea.hbm %s5551_s5, 16  ;;  %s4132_s6 = scalar_lea.hbm %s5689_s3, 32 }
 0x22d   : > { %p4129_p11 = scmp.ne.s32.totalorder %s5551_s5, %s4128_s13  ;;  %p4133_p13 = scmp.lt.u32.totalorder %s5551_s5, %s5689_s3 }
 0x22e   : > { %p4134_p12 = scmp.lt.u32.totalorder %s4132_s6, %s4128_s13  ;;  %p4136_p6 = scmp.lt.u32.totalorder %s4128_s13, %s5551_s5 }
 0x22f   : > { %p4130_p2 = pnand %p4129_p11, %p5735_p5 }
 0x230   : > { %p4135_p0 = por %p4134_p12, %p4133_p13 }
 0x231   : > { %p4131_p8 = pneg %p4130_p2 }
 0x232   : > { %p4137_p1 = por %p4136_p6, %p4135_p0 }
 0x234   : > { %p4138_p3 = pnand %p4137_p1, %p4131_p8 }
 0x236   : > { %4141 = shalt.err (!%p4138_p3)
}
 0x237   : > { %3974 = dma.vmem_to_hbm [thread:$0]  (%p5735_p5), %s5553_s11, 16, %s5551_s5, %s3713_s8   ;;  %v1996_v10 = vpop.permute.xlu0 %1995  ;;  %v1993_v53 = vpop.permute.xlu1 %1992 }
 0x238   : > { %v2074_v54 = vrot.slane %v1993_v53, %v5488_v19  ;;  %v2081_v22 = vrot.slane %v1996_v10, %v5472_v2  ;;  %p298_p4 = scmp.lt.s32.totalorder %s4274_s19, 1  ;;  %s287_s8 = scalar_lea.vmem [#allocation8], %s4403_s12 }
 0x239   : > { %s3742_s7 = sshll.u32 %s287_s8, 4  ;;  %s5642_s14 = scalar_lea.hbm %s5690_s4, %s3888_s26  ;;  %s5644_s7 = int_to_ptr.vmem [resolvable:$true] %s3742_s7 }
 0x23a   : > { %v2076_v61 = vsel %vm2075_vm7, %v2074_v54, %v2069_v23  ;;  %s299_s11 = scalar_select %p298_p4, %s4274_s19, 1 }
 0x23b   : > { %v2083_v37 = vsel %vm2082_vm8, %v2081_v22, %v2076_v61  ;;  %v3475_v51 = vpop.permute.xlu0 %3474  ;;  %s3717_s13 = scalar_lea.sflag [#allocation9], %s4403_s12  ;;  %s4142_s22 = scalar_lea.vmem %s5644_s7, 16 }
 0x23c   : > { %v1999_v41 = vpop.permute.xlu1 %1998  ;;  %v3525_v15 = vrot.slane %v3475_v51, %v5427_v20  ;;  %s300_s5 = scalar_lea.vmem %s5688_s2, %s299_s11  ;;  %p4143_p7 = scmp.ne.s32.totalorder %s5644_s7, %s4142_s22 }
 0x23d   : > { %v2088_v32 = vrot.slane %v1999_v41, %v5501_v35  ;;  %s4227_s23 = smov [#allocation8]  }
 0x23e   : > { %p4144_p9 = pnand %p4143_p7, %p5735_p5  ;;  %s4146_s6 = sshll.u32 %s4227_s23, 4  ;;  %s4147_s6 = int_to_ptr.vmem [resolvable:$false] %s4146_s6 }
 0x23f   : > { %v2090_v63 = vsel %vm2089_vm9, %v2088_v32, %v2083_v37  ;;  %v3481_v47 = vpop.permute.xlu0 %3480  ;;  %v509_v32 = vld [vmem:[%s300_s5] sm:$0x1]  ;;  %s4148_s19 = scalar_lea.vmem %s4147_s6, 32  ;;  %p4149_p11 = scmp.lt.s32.totalorder %s5644_s7, %s4147_s6 }
 0x240   : > { %v3535_v27 = vrot.slane %v3481_v47, %v5435_v40  ;;  %p4145_p10 = pneg %p4144_p9  ;;  %p4150_p2 = scmp.lt.s32.totalorder %s4148_s19, %s4142_s22 }
 0x242   : > { %p4151_p8 = por %p4150_p2, %p4149_p11 }
 0x243   : > { %v3487_v18 = vpop.permute.xlu0 %3486 }
 0x244   : > { %p4152_p13 = pnand %p4151_p8, %p4145_p10 }
 0x247   : > { %v2002_v44 = vpop.permute.xlu1 %2001  ;;  %v3493_v50 = vpop.permute.xlu0 %3492 }
 0x248   : > { %v2095_v14 = vrot.slane %v2002_v44, %v5504_v7  ;;  %v3555_v28 = vrot.slane %v3493_v50, %v5485_v5 }
 0x24a   : > { %v2097_v45 = vsel %vm2096_vm10, %v2095_v14, %v2090_v63 }
 0x24b   : > { %v3499_v1 = vpop.permute.xlu0 %3498 }
 0x24c   : > { %v3565_v25 = vrot.slane %v3499_v1, %v5472_v2 }
 0x24f   : > { %v3502_v60 = vpop.permute.xlu0 %3501 }
 0x250   : > { %v3570_v48 = vrot.slane %v3502_v60, %v5501_v35 }
 0x251   : > { %v2005_v36 = vpop.permute.xlu1 %2004 }
 0x252   : > { %v2102_v23 = vrot.slane %v2005_v36, %v5515_v58 }
 0x254   : > { %v2104_v61 = vsel %vm2103_vm11, %v2102_v23, %v2097_v45  ;;  %v638_v45 = vsub.f32 1.0, %v509_v32 }
 0x256   : > { %v3505_v20 = vpop.permute.xlu0 %3504 }
 0x25c   : > { %v2008_v43 = vpop.permute.xlu1 %2007 }
 0x25d   : > { %v2109_v35 = vrot.slane %v2008_v43, %v5519_v42 }
 0x25f   : > { %v2111_v41 = vsel %vm2110_vm12, %v2109_v35, %v2104_v61 }
 0x261   : > { %v3472_v3 = vpop.permute.xlu1 %3471 }
 0x262   : > { %v3521_v12 = vrot.slane %v3472_v3, %v5419_v59  ;;  %v3545_v59 = vrot.slane %v3487_v18, %v5463_v17 }
 0x264   : > { %v3526_v4 = vsel %vm2026_vm0, %v3525_v15, %v3521_v12 }
 0x266   : > { %v3508_v16 = vpop.permute.xlu0 %3507 }
 0x267   : > { %v3580_v31 = vrot.slane %v3508_v16, %v5515_v58 }
 0x26b   : > { %v3478_v46 = vpop.permute.xlu1 %3477 }
 0x26c   : > { %v3530_v56 = vrot.slane %v3478_v46, %v5432_v0 }
 0x26e   : > { %v3531_v6 = vsel %vm2033_vm1, %v3530_v56, %v3526_v4 }
 0x26f   : > { %v3536_v13 = vsel %vm2040_vm2, %v3535_v27, %v3531_v6 }
 0x271   : > { %v3511_v34 = vpop.permute.xlu0 %3510 }
 0x276   : > { %v3484_v39 = vpop.permute.xlu1 %3483 }
 0x277   : > { %v3540_v11 = vrot.slane %v3484_v39, %v5453_v62 }
 0x279   : > { %v3541_v55 = vsel %vm2047_vm3, %v3540_v11, %v3536_v13 }
 0x27a   : > { %v3546_v0 = vsel %vm2054_vm4, %v3545_v59, %v3541_v55 }
 0x27b   : > { %v3514_v62 = vpop.permute.xlu0 %3513 }
 0x27c   : > { %v3590_v10 = vrot.slane %v3514_v62, %v5530_v49 }
 0x280   : > { %v3490_v40 = vpop.permute.xlu1 %3489 }
 0x281   : > { %v3550_v30 = vrot.slane %v3490_v40, %v5475_v21  ;;  %v3575_v21 = vrot.slane %v3505_v20, %v5504_v7 }
 0x283   : > { %v3551_v29 = vsel %vm2061_vm5, %v3550_v30, %v3546_v0 }
 0x284   : > { %v3556_v26 = vsel %vm2068_vm6, %v3555_v28, %v3551_v29 }
 0x286   : > { %v3517_v38 = vpop.permute.xlu0 %3516 }
 0x287   : > { %v3595_v53 = vrot.slane %v3517_v38, %v5533_v24 }
 0x28b   : > { %v3496_v57 = vpop.permute.xlu1 %3495 }
 0x28c   : > { %v3560_v17 = vrot.slane %v3496_v57, %v5488_v19  ;;  %v3585_v19 = vrot.slane %v3511_v34, %v5519_v42 }
 0x28e   : > { %v3561_v33 = vsel %vm2075_vm7, %v3560_v17, %v3556_v26 }
 0x28f   : > { %v3566_v5 = vsel %vm2082_vm8, %v3565_v25, %v3561_v33 }
 0x290   : > { %v3571_v8 = vsel %vm2089_vm9, %v3570_v48, %v3566_v5  ;;  %v2011_v9 = vpop.permute.xlu1 %2010 }
 0x291   : > { %v3576_v2 = vsel %vm2096_vm10, %v3575_v21, %v3571_v8  ;;  %v2116_v54 = vrot.slane %v2011_v9, %v5530_v49 }
 0x292   : > { %v3581_v7 = vsel %vm2103_vm11, %v3580_v31, %v3576_v2 }
 0x293   : > { %v3586_v22 = vsel %vm2110_vm12, %v3585_v19, %v3581_v7  ;;  %v2118_v44 = vsel %vm2117_vm13, %v2116_v54, %v2111_v41 }
 0x294   : > { %v3591_v58 = vsel %vm2117_vm13, %v3590_v10, %v3586_v22 }
 0x295   : > { %v3596_v37 = vsel %vm2124_vm14, %v3595_v53, %v3591_v58 }
 0x296   : > { %v2014_v42 = vpop.permute.xlu1 %2013  ;;  %v3603_v63 = vrot.slane %v3596_v37, %v4551_v52 }
 0x297   : > { %v2123_v49 = vrot.slane %v2014_v42, %v5533_v24 }
 0x298   : > { %v3610_v51 = vrot.slane %v3603_v63, %v4551_v52 }
 0x299   : > { %v2125_v14 = vsel %vm2124_vm14, %v2123_v49, %v2118_v44 }
 0x29a   : > { %v2132_v36 = vrot.slane %v2125_v14, %v4551_v52  ;;  %v3612_v43 = vmul.f32 %v3610_v51, %v509_v32 }
 0x29c   : > { %v2139_v47 = vrot.slane %v2132_v36, %v4551_v52 }
 0x29e   : > { %v2141_v18 = vmul.f32 %v2139_v47, %v638_v45 }
 0x2a0   : > { %v3613_v24 = vadd.f32 %v3612_v43, %v2141_v18 }
 0x2a2   : > { %3711 = vst [vmem:[%s287_s8] sm:$0x1] %v3613_v24 }
 0x2a3   : > { %4155 = shalt.err (!%p4152_p13)
}
 0x2a4   : > { %s4156_s12 = scalar_lea.hbm %s5642_s14, 16  ;;  %s4160_s20 = scalar_lea.hbm %s5690_s4, 32 }
 0x2a5   : > { %p4157_p12 = scmp.ne.s32.totalorder %s5642_s14, %s4156_s12  ;;  %p4161_p1 = scmp.lt.u32.totalorder %s5642_s14, %s5690_s4 }
 0x2a6   : > { %p4162_p3 = scmp.lt.u32.totalorder %s4160_s20, %s4156_s12  ;;  %p4164_p7 = scmp.lt.u32.totalorder %s4156_s12, %s5642_s14 }
 0x2a7   : > { %p4158_p0 = pnand %p4157_p12, %p5735_p5 }
 0x2a8   : > { %p4163_p4 = por %p4162_p3, %p4161_p1 }
 0x2a9   : > { %p4159_p6 = pneg %p4158_p0 }
 0x2aa   : > { %p4165_p9 = por %p4164_p7, %p4163_p4 }
 0x2ac   : > { %p4166_p10 = pnand %p4165_p9, %p4159_p6 }
 0x2ae   : > { %4169 = shalt.err (!%p4166_p10)
}
 0x2af   : > { %3975 = dma.vmem_to_hbm [thread:$0]  (%p5735_p5), %s5644_s7, 16, %s5642_s14, %s3717_s13  }
 0x2b0 PF: > { %s3754_s30 = sand.u32 1, %s4204_s15   ;;  %p5736_p11 = scmp.ne.s32.totalorder %s5709_s28, 0 }
 0x2b1   : > { %p5737_p2 = scmp.ge.s32.totalorder %s4216_s18, 2  ;;  %s3755_s5 = scalar_lea.sflag [#allocation4], %s3754_s30 }
 0x2b3   : > { %p3979_p8 = pnand %p5737_p2, %p5736_p11 }
 0x2b5   : > { %4195 = dma.done.wait (!%p3979_p8), %s3755_s5, 16  }
 0x2b6   : > { %4197 = vsyncadd (!%p3979_p8), %s3755_s5, 4294967280  ;;  %s3763_s8 = scalar_lea.sflag [#allocation9], %s3754_s30 }
 0x2b7   : > { %4199 = dma.done.wait (!%p3979_p8), %s3763_s8, 16  }
 0x2b8   : > { %4201 = vsyncadd (!%p3979_p8), %s3763_s8, 4294967280  ;;  %p24_p5 = scmp.ge.s32.totalorder %s4278_s21, 4   ;;  %s5738_s15 = smov %s4208_s16 }
 0x2b9   : > { %s5739_s16 = smov %s4212_s17  ;;  %s5740_s17 = smov %s4290_s24 }
 0x2ba   : > { %s5741_s18 = smov %s4278_s21  ;;  %26 = sbr.rel (!%p24_p5) target bundleno = 9 (0x9), region = 110 }
 0x2c1   :  { %3767 = vsyncpa [#allocation3], 1 }
 0x2c2   :  { %3769 = vsyncpa [#allocation3 + $0x1], 1 }
 0x2c3   :  { %3770 = vsyncpa [#allocation6], 1 }
 0x2c4   :  { %3772 = vsyncpa [#allocation6 + $0x1], 1 }
 0x2c5   :  { %3773 = vsyncpa [#allocation4], 1 }
 0x2c6   :  { %3775 = vsyncpa [#allocation4 + $0x1], 1 }
 0x2c7   :  { %3776 = vsyncpa [#allocation9], 1 }
 0x2c8   :  { %3778 = vsyncpa [#allocation9 + $0x1], 1 }

// kernel: tpu_custom_call.1
= control target key start
LH: loop header
LB: loop body
LE: loop exit
PB: predicated region body
PF: predicated region fallthrough
CT: control target
= control target key end

     0   :  { %s1062_s15 = smov 0   ;;  %s1389_s0 = inlined_call_operand.vmem [shape: bf16[200,128], index: 0, kind: input, shape index: {}]   ;;  %s1390_s1 = inlined_call_operand.vmem [shape: bf16[200,128], index: 1, kind: input, shape index: {}]   ;;  %s1391_s2 = inlined_call_operand.vmem [shape: f32[256,1], index: 2, kind: input, shape index: {}]   ;;  %s1392_s3 = inlined_call_operand.vmem [shape: f32[256,1], index: 3, kind: output, shape index: {0}]   ;;  %s1393_s4 = inlined_call_operand.vmem [shape: f32[256,1], index: 4, kind: output, shape index: {1}]  }
   0x1 LB: > { %s894_s16 = sadd.s32 4294967295, %s1035_s15   ;;  %p898_p0 = scmp.ge.s32.totalorder %s1035_s15, 1  ;;  %s1035_s15 = sphi %s1062_s15, %s15_s15  }
   0x2   : > { %p204_p1 = scmp.lt.s32.totalorder %s1035_s15, 3 }
   0x4   : > { %p205_p2 = pnand %p898_p0, %p204_p1 }
   0x5   : > { %s1070_s17 = sshll.u32 (!%p205_p2), %s894_s16, 4  ;;  %vm747_vm0 = vcmask (!%p205_p2), 7168  }
   0x6   : > { %208 = sbr.rel (%p205_p2) target bundleno = 284 (0x11c), region = 32  ;;  %p258_p3 = scmp.lt.s32.totalorder (!%p205_p2), %s1070_s17, 24 }
   0x7   : > { %p282_p4 = scmp.lt.s32.totalorder (!%p205_p2), %s1070_s17, 31 }
   0xd   : > { %s1074_s18 = scalar_select %p258_p3, %s1070_s17, 24 }
   0xe   : > { %s1395_s17 = smov (!%p282_p4, %s1070_s17), 31 }
   0xf   : > { %s900_s19 = sshll.u32 %s1074_s18, 2  ;;  %s1191_s26 = sshll.u32 %s1395_s17, 3 }
  0x10   : > { %s1082_s22 = scalar_lea.vmem %s1389_s0, %s900_s19  ;;  %s1149_s25 = scalar_lea.vmem %s1390_s1, %s900_s19 }
  0x11   : > { %v975_v0 = vld [vmem:[%s1082_s22 + $0x8] sm:$0xff]   ;;  %v912_v1 = vld [vmem:[%s1082_s22] sm:$0xff]   ;;  %v976_v6 = vld [vmem:[%s1082_s22 + $0x10] sm:$0xff]   ;;  %s1197_s29 = scalar_lea.vmem %s1391_s2, %s1191_s26  ;;  %s1246_s6 = scalar_lea.vmem %s1392_s3, %s1191_s26 }
  0x12   : > { %v1086_v2 = vunpack.c.l.bf16 %v975_v0  ;;  %v1088_v3 = vunpack.c.l.bf16 %v912_v1  ;;  %v1090_v4 = vunpack.c.h.bf16 %v975_v0  ;;  %v1092_v5 = vunpack.c.h.bf16 %v912_v1  ;;  %v977_v13 = vld [vmem:[%s1082_s22 + $0x18] sm:$0xff]   ;;  %v978_v18 = vld [vmem:[%s1082_s22 + $0x20] sm:$0xff]   ;;  %v979_v23 = vld [vmem:[%s1082_s22 + $0x28] sm:$0xff]   ;;  %s1284_s9 = scalar_lea.vmem %s1393_s4, %s1191_s26 }
  0x13   : > { %v1103_v11 = vunpack.c.h.bf16 %v976_v6  ;;  %v1105_v12 = vunpack.c.l.bf16 %v976_v6  ;;  %v1112_v16 = vunpack.c.h.bf16 %v977_v13  ;;  %v1114_v17 = vunpack.c.l.bf16 %v977_v13  ;;  %v980_v28 = vld [vmem:[%s1082_s22 + $0x30] sm:$0xff]   ;;  %v981_v33 = vld [vmem:[%s1082_s22 + $0x38] sm:$0xff]   ;;  %v944_v38 = vld [vmem:[%s1149_s25] sm:$0xff]  }
  0x14   : > { %v365_v7 = vmul.f32 %v1086_v2, %v1086_v2  ;;  %v363_v8 = vmul.f32 %v1088_v3, %v1088_v3  ;;  %v366_v9 = vmul.f32 %v1090_v4, %v1090_v4  ;;  %v364_v10 = vmul.f32 %v1092_v5, %v1092_v5  ;;  %v982_v43 = vld [vmem:[%s1149_s25 + $0x8] sm:$0xff]   ;;  %v983_v48 = vld [vmem:[%s1149_s25 + $0x10] sm:$0xff]   ;;  %v984_v53 = vld [vmem:[%s1149_s25 + $0x18] sm:$0xff]  }
  0x15   : > { %v368_v14 = vmul.f32 %v1103_v11, %v1103_v11  ;;  %v367_v15 = vmul.f32 %v1105_v12, %v1105_v12  ;;  %v370_v19 = vmul.f32 %v1112_v16, %v1112_v16  ;;  %v369_v20 = vmul.f32 %v1114_v17, %v1114_v17  ;;  %v985_v58 = vld [vmem:[%s1149_s25 + $0x20] sm:$0xff]   ;;  %v986_v63 = vld [vmem:[%s1149_s25 + $0x28] sm:$0xff]  }
  0x16   : > { %383 = vadd.xlane.f32.xlu1 %v365_v7  ;;  %379 = vadd.xlane.f32.xlu0 %v363_v8  ;;  %v1121_v21 = vunpack.c.h.bf16 %v978_v18  ;;  %v1123_v22 = vunpack.c.l.bf16 %v978_v18  ;;  %v1130_v26 = vunpack.c.h.bf16 %v979_v23  ;;  %v1132_v27 = vunpack.c.l.bf16 %v979_v23  ;;  %v987_v8 = vld [vmem:[%s1149_s25 + $0x30] sm:$0xff]  }
  0x17   : > { %v1139_v31 = vunpack.c.h.bf16 %v980_v28  ;;  %v1141_v32 = vunpack.c.l.bf16 %v980_v28  ;;  %v1155_v36 = vunpack.c.h.bf16 %v981_v33  ;;  %v1157_v37 = vunpack.c.l.bf16 %v981_v33 }
  0x18   : > { %v372_v24 = vmul.f32 %v1121_v21, %v1121_v21  ;;  %v371_v25 = vmul.f32 %v1123_v22, %v1123_v22  ;;  %v374_v29 = vmul.f32 %v1130_v26, %v1130_v26  ;;  %v373_v30 = vmul.f32 %v1132_v27, %v1132_v27 }
  0x19   : > { %v376_v34 = vmul.f32 %v1139_v31, %v1139_v31  ;;  %v375_v35 = vmul.f32 %v1141_v32, %v1141_v32  ;;  %v378_v39 = vmul.f32 %v1155_v36, %v1155_v36  ;;  %v377_v40 = vmul.f32 %v1157_v37, %v1157_v37 }
  0x1a   : > { %385 = vadd.xlane.f32.xlu1 %v366_v9  ;;  %381 = vadd.xlane.f32.xlu0 %v364_v10  ;;  %v946_v41 = vunpack.c.h.bf16 %v944_v38  ;;  %v945_v42 = vunpack.c.l.bf16 %v944_v38  ;;  %v950_v46 = vunpack.c.h.bf16 %v982_v43  ;;  %v949_v47 = vunpack.c.l.bf16 %v982_v43 }
  0x1b   : > { %v954_v51 = vunpack.c.h.bf16 %v983_v48  ;;  %v953_v52 = vunpack.c.l.bf16 %v983_v48  ;;  %v958_v56 = vunpack.c.h.bf16 %v984_v53  ;;  %v957_v57 = vunpack.c.l.bf16 %v984_v53 }
  0x1c   : > { %v412_v44 = vmul.f32 %v946_v41, %v946_v41  ;;  %v411_v45 = vmul.f32 %v945_v42, %v945_v42  ;;  %v414_v49 = vmul.f32 %v950_v46, %v950_v46  ;;  %v413_v50 = vmul.f32 %v949_v47, %v949_v47 }
  0x1d   : > { %v416_v54 = vmul.f32 %v954_v51, %v954_v51  ;;  %v415_v55 = vmul.f32 %v953_v52, %v953_v52  ;;  %v418_v59 = vmul.f32 %v958_v56, %v958_v56  ;;  %v417_v60 = vmul.f32 %v957_v57, %v957_v57 }
  0x1e   : > { %389 = vadd.xlane.f32.xlu1 %v368_v14  ;;  %387 = vadd.xlane.f32.xlu0 %v367_v15  ;;  %v962_v61 = vunpack.c.h.bf16 %v985_v58  ;;  %v961_v62 = vunpack.c.l.bf16 %v985_v58  ;;  %v966_v6 = vunpack.c.h.bf16 %v986_v63  ;;  %v965_v7 = vunpack.c.l.bf16 %v986_v63  ;;  %v988_v15 = vld [vmem:[%s1149_s25 + $0x38] sm:$0xff]  }
  0x1f   : > { %v970_v13 = vunpack.c.h.bf16 %v987_v8  ;;  %v969_v14 = vunpack.c.l.bf16 %v987_v8  ;;  %v973_v23 = vunpack.c.l.bf16 %v988_v15  ;;  %v460_v28 = vmul.f32 %v946_v41, %v1092_v5 }
  0x20   : > { %v420_v0 = vmul.f32 %v962_v61, %v962_v61  ;;  %v419_v1 = vmul.f32 %v961_v62, %v961_v62  ;;  %v422_v9 = vmul.f32 %v966_v6, %v966_v6  ;;  %v421_v10 = vmul.f32 %v965_v7, %v965_v7 }
  0x21   : > { %v424_v18 = vmul.f32 %v970_v13, %v970_v13  ;;  %v461_v33 = vmul.f32 %v949_v47, %v1086_v2  ;;  %v466_v38 = vmul.f32 %v958_v56, %v1112_v16  ;;  %v465_v5 = vmul.f32 %v957_v57, %v1114_v17 }
  0x22   : > { %393 = vadd.xlane.f32.xlu1 %v370_v19  ;;  %391 = vadd.xlane.f32.xlu0 %v369_v20  ;;  %v423_v19 = vmul.f32 %v969_v14, %v969_v14  ;;  %v974_v20 = vunpack.c.h.bf16 %v988_v15  ;;  %v470_v2 = vmul.f32 %v966_v6, %v1130_v26  ;;  %v471_v16 = vmul.f32 %v969_v14, %v1141_v32 }
  0x24   : > { %v474_v17 = vmul.f32 %v974_v20, %v1155_v36 }
  0x26   : > { %397 = vadd.xlane.f32.xlu1 %v372_v24  ;;  %395 = vadd.xlane.f32.xlu0 %v371_v25  ;;  %v426_v24 = vmul.f32 %v974_v20, %v974_v20  ;;  %v425_v25 = vmul.f32 %v973_v23, %v973_v23  ;;  %v1200_v20 = vld [vmem:[%s1197_s29 + $0x8] sm:$0xff] }
  0x2a   : > { %401 = vadd.xlane.f32.xlu1 %v374_v29  ;;  %399 = vadd.xlane.f32.xlu0 %v373_v30  ;;  %v459_v29 = vmul.f32 %v945_v42, %v1088_v3  ;;  %v462_v30 = vmul.f32 %v950_v46, %v1090_v4  ;;  %v468_v3 = vmul.f32 %v962_v61, %v1121_v21 }
  0x2b   : > { %v467_v4 = vmul.f32 %v961_v62, %v1123_v22  ;;  %v473_v21 = vmul.f32 %v973_v23, %v1157_v37 }
  0x2e   : > { %405 = vadd.xlane.f32.xlu1 %v376_v34  ;;  %403 = vadd.xlane.f32.xlu0 %v375_v35  ;;  %v464_v34 = vmul.f32 %v954_v51, %v1103_v11  ;;  %v463_v35 = vmul.f32 %v953_v52, %v1105_v12  ;;  %v469_v11 = vmul.f32 %v965_v7, %v1132_v27 }
  0x2f   : > { %v472_v12 = vmul.f32 %v970_v13, %v1139_v31 }
  0x32   : > { %409 = vadd.xlane.f32.xlu1 %v378_v39  ;;  %407 = vadd.xlane.f32.xlu0 %v377_v40 }
  0x36   : > { %429 = vadd.xlane.f32.xlu1 %v412_v44  ;;  %427 = vadd.xlane.f32.xlu0 %v411_v45 }
  0x3a   : > { %433 = vadd.xlane.f32.xlu1 %v414_v49  ;;  %431 = vadd.xlane.f32.xlu0 %v413_v50 }
  0x3e   : > { %437 = vadd.xlane.f32.xlu1 %v416_v54  ;;  %435 = vadd.xlane.f32.xlu0 %v415_v55 }
  0x42   : > { %441 = vadd.xlane.f32.xlu1 %v418_v59  ;;  %439 = vadd.xlane.f32.xlu0 %v417_v60 }
  0x46   : > { %445 = vadd.xlane.f32.xlu1 %v420_v0  ;;  %443 = vadd.xlane.f32.xlu0 %v419_v1 }
  0x4a   : > { %449 = vadd.xlane.f32.xlu1 %v422_v9  ;;  %447 = vadd.xlane.f32.xlu0 %v421_v10 }
  0x4e   : > { %453 = vadd.xlane.f32.xlu1 %v424_v18  ;;  %451 = vadd.xlane.f32.xlu0 %v423_v19 }
  0x52   : > { %457 = vadd.xlane.f32.xlu1 %v426_v24  ;;  %455 = vadd.xlane.f32.xlu0 %v425_v25  ;;  %v1203_v25 = vld [vmem:[%s1197_s29] sm:$0xff] }
  0x56   : > { %477 = vadd.xlane.f32.xlu1 %v460_v28  ;;  %475 = vadd.xlane.f32.xlu0 %v459_v29  ;;  %v1206_v28 = vld [vmem:[%s1197_s29 + $0x18] sm:$0xff] }
  0x5a   : > { %481 = vadd.xlane.f32.xlu1 %v462_v30  ;;  %479 = vadd.xlane.f32.xlu0 %v461_v33 }
  0x5e   : > { %485 = vadd.xlane.f32.xlu1 %v464_v34  ;;  %483 = vadd.xlane.f32.xlu0 %v463_v35  ;;  %v1209_v35 = vld [vmem:[%s1197_s29 + $0x10] sm:$0xff] }
  0x62   : > { %489 = vadd.xlane.f32.xlu1 %v466_v38  ;;  %487 = vadd.xlane.f32.xlu0 %v465_v5  ;;  %v652_v38 = vsub.f32 1.0, %v1200_v20 }
  0x66   : > { %493 = vadd.xlane.f32.xlu1 %v468_v3  ;;  %491 = vadd.xlane.f32.xlu0 %v467_v4  ;;  %v1213_v4 = vld [vmem:[%s1197_s29 + $0x28] sm:$0xff] }
  0x6a   : > { %497 = vadd.xlane.f32.xlu1 %v470_v2  ;;  %495 = vadd.xlane.f32.xlu0 %v469_v11  ;;  %v1216_v2 = vld [vmem:[%s1197_s29 + $0x20] sm:$0xff] }
  0x6e   : > { %501 = vadd.xlane.f32.xlu1 %v472_v12  ;;  %499 = vadd.xlane.f32.xlu0 %v471_v16  ;;  %v651_v12 = vsub.f32 1.0, %v1203_v25  ;;  %v654_v16 = vsub.f32 1.0, %v1206_v28 }
  0x72   : > { %505 = vadd.xlane.f32.xlu1 %v474_v17  ;;  %503 = vadd.xlane.f32.xlu0 %v473_v21 }
  0xa3   : > { %v384_v22 = vpop.xlane.xlu1 %383  ;;  %v380_v39 = vpop.xlane.xlu0 %379 }
  0xa7   : > { %v386_v40 = vpop.xlane.xlu1 %385  ;;  %v382_v26 = vpop.xlane.xlu0 %381 }
  0xab   : > { %v390_v41 = vpop.xlane.xlu1 %389  ;;  %v388_v27 = vpop.xlane.xlu0 %387 }
  0xaf   : > { %v394_v42 = vpop.xlane.xlu1 %393  ;;  %v392_v43 = vpop.xlane.xlu0 %391 }
  0xb3   : > { %v398_v44 = vpop.xlane.xlu1 %397  ;;  %v396_v31 = vpop.xlane.xlu0 %395 }
  0xb7   : > { %v402_v32 = vpop.xlane.xlu1 %401  ;;  %v400_v45 = vpop.xlane.xlu0 %399 }
  0xbb   : > { %v406_v46 = vpop.xlane.xlu1 %405  ;;  %v404_v47 = vpop.xlane.xlu0 %403 }
  0xbf   : > { %v410_v36 = vpop.xlane.xlu1 %409  ;;  %v1187_v37 = vpop.xlane.xlu0 %407 }
  0xc3   : > { %v430_v48 = vpop.xlane.xlu1 %429  ;;  %v428_v49 = vpop.xlane.xlu0 %427 }
  0xc4   : > { %v524_v58 = vmul.f32 %v430_v48, %v382_v26  ;;  %v523_v59 = vmul.f32 %v428_v49, %v380_v39  ;;  %v653_v39 = vsub.f32 1.0, %v1209_v35  ;;  %v1225_v26 = vld [vmem:[%s1197_s29 + $0x30] sm:$0xff] }
  0xc6   : > { %997 = vrsqrt.f32 %v524_v58 }
  0xc7   : > { %v434_v50 = vpop.xlane.xlu1 %433  ;;  %v432_v51 = vpop.xlane.xlu0 %431  ;;  %999 = vrsqrt.f32 %v523_v59 }
  0xc8   : > { %v526_v62 = vmul.f32 %v434_v50, %v386_v40  ;;  %v525_v63 = vmul.f32 %v432_v51, %v384_v22  ;;  %v1222_v40 = vld [vmem:[%s1197_s29 + $0x38] sm:$0xff]  ;;  %v1240_v51 = vld [vmem:[%s1197_s29 + $0x50] sm:$0xff] }
  0xc9   : > { %v1237_v50 = vld [vmem:[%s1197_s29 + $0x58] sm:$0xff] }
  0xca   : > { %1001 = vrsqrt.f32 %v526_v62 }
  0xcb   : > { %v438_v52 = vpop.xlane.xlu1 %437  ;;  %v436_v53 = vpop.xlane.xlu0 %435  ;;  %1003 = vrsqrt.f32 %v525_v63 }
  0xcc   : > { %v528_v0 = vmul.f32 %v438_v52, %v390_v41  ;;  %v527_v1 = vmul.f32 %v436_v53, %v388_v27  ;;  %v1228_v41 = vld [vmem:[%s1197_s29 + $0x48] sm:$0xff]  ;;  %v657_v53 = vsub.f32 1.0, %v1225_v26 }
  0xce   : > { %1005 = vrsqrt.f32 %v528_v0  ;;  %v662_v0 = vsub.f32 1.0, %v1237_v50 }
  0xcf   : > { %v442_v54 = vpop.xlane.xlu1 %441  ;;  %v440_v55 = vpop.xlane.xlu0 %439  ;;  %1007 = vrsqrt.f32 %v527_v1  ;;  %v661_v1 = vsub.f32 1.0, %v1240_v51 }
  0xd0   : > { %v530_v8 = vmul.f32 %v442_v54, %v394_v42  ;;  %v529_v9 = vmul.f32 %v440_v55, %v392_v43  ;;  %v998_v23 = vpop.eup %997  ;;  %v660_v54 = vsub.f32 1.0, %v1228_v41 }
  0xd1   : > { %v1000_v29 = vpop.eup %999 }
  0xd2   : > { %1009 = vrsqrt.f32 %v530_v8 }
  0xd3   : > { %v446_v56 = vpop.xlane.xlu1 %445  ;;  %v444_v57 = vpop.xlane.xlu0 %443  ;;  %1011 = vrsqrt.f32 %v529_v9 }
  0xd4   : > { %v532_v10 = vmul.f32 %v446_v56, %v398_v44  ;;  %v531_v13 = vmul.f32 %v444_v57, %v396_v31  ;;  %v1002_v17 = vpop.eup %1001  ;;  %v656_v31 = vsub.f32 1.0, %v1213_v4 }
  0xd5   : > { %v1004_v27 = vpop.eup %1003 }
  0xd6   : > { %1013 = vrsqrt.f32 %v532_v10 }
  0xd7   : > { %v450_v60 = vpop.xlane.xlu1 %449  ;;  %v448_v61 = vpop.xlane.xlu0 %447  ;;  %1015 = vrsqrt.f32 %v531_v13 }
  0xd8   : > { %v534_v18 = vmul.f32 %v450_v60, %v402_v32  ;;  %v533_v19 = vmul.f32 %v448_v61, %v400_v45  ;;  %v655_v32 = vsub.f32 1.0, %v1216_v2  ;;  %v1234_v45 = vld [vmem:[%s1197_s29 + $0x40] sm:$0xff] }
  0xd9   : > { %v659_v63 = vsub.f32 1.0, %v1234_v45 }
  0xda   : > { %1017 = vrsqrt.f32 %v534_v18 }
  0xdb   : > { %v454_v6 = vpop.xlane.xlu1 %453  ;;  %v452_v7 = vpop.xlane.xlu0 %451  ;;  %1019 = vrsqrt.f32 %v533_v19 }
  0xdc   : > { %v536_v24 = vmul.f32 %v454_v6, %v406_v46  ;;  %v535_v30 = vmul.f32 %v452_v7, %v404_v47  ;;  %v1006_v46 = vpop.eup %1005 }
  0xdd   : > { %v1008_v52 = vpop.eup %1007 }
  0xde   : > { %1021 = vrsqrt.f32 %v536_v24  ;;  %v1010_v55 = vpop.eup %1009 }
  0xdf   : > { %v458_v14 = vpop.xlane.xlu1 %457  ;;  %v456_v15 = vpop.xlane.xlu0 %455  ;;  %1023 = vrsqrt.f32 %v535_v30 }
  0xe0   : > { %v538_v11 = vmul.f32 %v458_v14, %v410_v36  ;;  %v537_v42 = vmul.f32 %v456_v15, %v1187_v37  ;;  %v658_v37 = vsub.f32 1.0, %v1222_v40  ;;  %v1012_v60 = vpop.eup %1011 }
  0xe1   : > { %v1254_v6 = vpop.eup %1013 }
  0xe2   : > { %1025 = vrsqrt.f32 %v538_v11  ;;  %v1260_v13 = vpop.eup %1015 }
  0xe3   : > { %v478_v33 = vpop.xlane.xlu1 %477  ;;  %v476_v34 = vpop.xlane.xlu0 %475  ;;  %1027 = vrsqrt.f32 %v537_v42 }
  0xe4   : > { %v556_v5 = vmul.f32 %v998_v23, %v478_v33  ;;  %v555_v3 = vmul.f32 %v1000_v29, %v476_v34  ;;  %v1262_v23 = vpop.eup %1017 }
  0xe5   : > { %v1266_v34 = vpop.eup %1019 }
  0xe6   : > { %v572_v21 = vsub.f32 1.0, %v556_v5  ;;  %v571_v22 = vsub.f32 1.0, %v555_v3 }
  0xe7   : > { %v482_v43 = vpop.xlane.xlu1 %481  ;;  %v480_v44 = vpop.xlane.xlu0 %479 }
  0xe8   : > { %v588_v47 = vadd.f32 1e-08, %v572_v21  ;;  %v587_v36 = vadd.f32 1e-08, %v571_v22  ;;  %v558_v48 = vmul.f32 %v1002_v17, %v482_v43  ;;  %v557_v49 = vmul.f32 %v1004_v27, %v480_v44  ;;  %v1268_v27 = vpop.eup %1021 }
  0xea   : > { %v604_v56 = vmul.f32 10.0, %v588_v47  ;;  %v603_v57 = vmul.f32 10.0, %v587_v36  ;;  %v574_v58 = vsub.f32 1.0, %v558_v48  ;;  %v573_v59 = vsub.f32 1.0, %v557_v49 }
  0xeb   : > { %v486_v61 = vpop.xlane.xlu1 %485  ;;  %v484_v62 = vpop.xlane.xlu0 %483 }
  0xec   : > { %v620_v7 = vsub.f32 0.2, %v604_v56  ;;  %v668_v8 = vmul.f32 %v604_v56, %v604_v56  ;;  %749 = vst.msk [vmem:[%s1246_s6 + $0x8] sm:$0xff] %vm747_vm0, %v604_v56  ;;  %v619_v9 = vsub.f32 0.2, %v603_v57  ;;  %v667_v10 = vmul.f32 %v603_v57, %v603_v57  ;;  %748 = vst.msk [vmem:[%s1246_s6] sm:$0xff] %vm747_vm0, %v603_v57 }
  0xed   : > { %v590_v14 = vadd.f32 1e-08, %v574_v58  ;;  %v589_v15 = vadd.f32 1e-08, %v573_v59  ;;  %v560_v18 = vmul.f32 %v1006_v46, %v486_v61  ;;  %v559_v19 = vmul.f32 %v1008_v52, %v484_v62 }
  0xee   : > { %v636_v24 = vmax.f32 %v620_v7, 0.0  ;;  %v684_v29 = vmul.f32 %v668_v8, %v652_v38  ;;  %v635_v30 = vmax.f32 %v619_v9, 0.0  ;;  %v683_v33 = vmul.f32 %v667_v10, %v651_v12  ;;  %v1270_v38 = vpop.eup %1023 }
  0xef   : > { %v606_v5 = vmul.f32 10.0, %v590_v14  ;;  %v605_v3 = vmul.f32 10.0, %v589_v15  ;;  %v576_v11 = vsub.f32 1.0, %v560_v18  ;;  %v575_v17 = vsub.f32 1.0, %v559_v19  ;;  %v490_v21 = vpop.xlane.xlu1 %489  ;;  %v488_v22 = vpop.xlane.xlu0 %487 }
  0xf0   : > { %v700_v42 = vmul.f32 %v636_v24, %v636_v24  ;;  %v699_v43 = vmul.f32 %v635_v30, %v635_v30  ;;  %v562_v44 = vmul.f32 %v1010_v55, %v490_v21  ;;  %v561_v46 = vmul.f32 %v1012_v60, %v488_v22  ;;  %v1278_v58 = vpop.eup %1025 }
  0xf1   : > { %v622_v12 = vsub.f32 0.2, %v606_v5  ;;  %v670_v47 = vmul.f32 %v606_v5, %v606_v5  ;;  %751 = vst.msk [vmem:[%s1246_s6 + $0x18] sm:$0xff] %vm747_vm0, %v606_v5  ;;  %v621_v36 = vsub.f32 0.2, %v605_v3  ;;  %v669_v48 = vmul.f32 %v605_v3, %v605_v3  ;;  %750 = vst.msk [vmem:[%s1246_s6 + $0x10] sm:$0xff] %vm747_vm0, %v605_v3  ;;  %v1290_v10 = vpop.eup %1027 }
  0xf2   : > { %v716_v49 = vmul.f32 %v700_v42, %v1200_v20  ;;  %v715_v52 = vmul.f32 %v699_v43, %v1203_v25  ;;  %v592_v56 = vadd.f32 1e-08, %v576_v11  ;;  %v591_v57 = vadd.f32 1e-08, %v575_v17 }
  0xf3   : > { %v638_v55 = vmax.f32 %v622_v12, 0.0  ;;  %v686_v59 = vmul.f32 %v670_v47, %v654_v16  ;;  %v637_v60 = vmax.f32 %v621_v36, 0.0  ;;  %v685_v20 = vmul.f32 %v669_v48, %v653_v39  ;;  %v494_v25 = vpop.xlane.xlu1 %493  ;;  %v492_v61 = vpop.xlane.xlu0 %491 }
  0xf4   : > { %v732_v62 = vadd.f32 %v716_v49, %v684_v29  ;;  %v731_v7 = vadd.f32 %v715_v52, %v683_v33  ;;  %v608_v8 = vmul.f32 10.0, %v592_v56  ;;  %v607_v9 = vmul.f32 10.0, %v591_v57 }
  0xf5   : > { %v702_v14 = vmul.f32 %v638_v55, %v638_v55  ;;  %v701_v15 = vmul.f32 %v637_v60, %v637_v60  ;;  %v578_v18 = vsub.f32 1.0, %v562_v44  ;;  %v577_v19 = vsub.f32 1.0, %v561_v46 }
  0xf6   : > { %765 = vst.msk [vmem:[%s1284_s9 + $0x8] sm:$0xff] %vm747_vm0, %v732_v62  ;;  %764 = vst.msk [vmem:[%s1284_s9] sm:$0xff] %vm747_vm0, %v731_v7  ;;  %v624_v16 = vsub.f32 0.2, %v608_v8  ;;  %v672_v39 = vmul.f32 %v608_v8, %v608_v8  ;;  %v623_v24 = vsub.f32 0.2, %v607_v9  ;;  %v671_v29 = vmul.f32 %v607_v9, %v607_v9 }
  0xf7   : > { %753 = vst.msk [vmem:[%s1246_s6 + $0x28] sm:$0xff] %vm747_vm0, %v608_v8  ;;  %752 = vst.msk [vmem:[%s1246_s6 + $0x20] sm:$0xff] %vm747_vm0, %v607_v9  ;;  %v718_v30 = vmul.f32 %v702_v14, %v1206_v28  ;;  %v717_v33 = vmul.f32 %v701_v15, %v1209_v35  ;;  %v594_v5 = vadd.f32 1e-08, %v578_v18  ;;  %v593_v3 = vadd.f32 1e-08, %v577_v19  ;;  %v498_v11 = vpop.xlane.xlu1 %497  ;;  %v496_v17 = vpop.xlane.xlu0 %495 }
  0xf8   : > { %v640_v21 = vmax.f32 %v624_v16, 0.0  ;;  %v688_v22 = vmul.f32 %v672_v39, %v656_v31  ;;  %v639_v42 = vmax.f32 %v623_v24, 0.0  ;;  %v687_v43 = vmul.f32 %v671_v29, %v655_v32 }
  0xf9   : > { %v734_v44 = vadd.f32 %v718_v30, %v686_v59  ;;  %v733_v28 = vadd.f32 %v717_v33, %v685_v20  ;;  %v610_v46 = vmul.f32 10.0, %v594_v5  ;;  %v609_v35 = vmul.f32 10.0, %v593_v3 }
  0xfa   : > { %v704_v12 = vmul.f32 %v640_v21, %v640_v21  ;;  %v703_v47 = vmul.f32 %v639_v42, %v639_v42  ;;  %v564_v36 = vmul.f32 %v1254_v6, %v494_v25  ;;  %v563_v48 = vmul.f32 %v1260_v13, %v492_v61 }
  0xfb   : > { %767 = vst.msk [vmem:[%s1284_s9 + $0x18] sm:$0xff] %vm747_vm0, %v734_v44  ;;  %766 = vst.msk [vmem:[%s1284_s9 + $0x10] sm:$0xff] %vm747_vm0, %v733_v28  ;;  %v626_v31 = vsub.f32 0.2, %v610_v46  ;;  %v674_v49 = vmul.f32 %v610_v46, %v610_v46  ;;  %v625_v32 = vsub.f32 0.2, %v609_v35  ;;  %v673_v52 = vmul.f32 %v609_v35, %v609_v35  ;;  %v502_v25 = vpop.xlane.xlu1 %501  ;;  %v500_v61 = vpop.xlane.xlu0 %499 }
  0xfc   : > { %755 = vst.msk [vmem:[%s1246_s6 + $0x38] sm:$0xff] %vm747_vm0, %v610_v46  ;;  %754 = vst.msk [vmem:[%s1246_s6 + $0x30] sm:$0xff] %vm747_vm0, %v609_v35  ;;  %v720_v56 = vmul.f32 %v704_v12, %v1213_v4  ;;  %v719_v57 = vmul.f32 %v703_v47, %v1216_v2  ;;  %v580_v55 = vsub.f32 1.0, %v564_v36  ;;  %v579_v6 = vsub.f32 1.0, %v563_v48  ;;  %v520_v12 = vld [vmem:[%s1197_s29 + $0x68] sm:$0xff]  ;;  %v519_v47 = vld [vmem:[%s1197_s29 + $0x60] sm:$0xff] }
  0xfd   : > { %v642_v13 = vmax.f32 %v626_v31, 0.0  ;;  %v690_v59 = vmul.f32 %v674_v49, %v658_v37  ;;  %v641_v60 = vmax.f32 %v625_v32, 0.0  ;;  %v689_v20 = vmul.f32 %v673_v52, %v657_v53 }
  0xfe   : > { %v736_v62 = vadd.f32 %v720_v56, %v688_v22  ;;  %v735_v7 = vadd.f32 %v719_v57, %v687_v43  ;;  %v596_v8 = vadd.f32 1e-08, %v580_v55  ;;  %v595_v4 = vadd.f32 1e-08, %v579_v6 }
  0xff   : > { %v706_v9 = vmul.f32 %v642_v13, %v642_v13  ;;  %v705_v2 = vmul.f32 %v641_v60, %v641_v60  ;;  %v566_v14 = vmul.f32 %v1262_v23, %v498_v11  ;;  %v565_v15 = vmul.f32 %v1266_v34, %v496_v17 }
 0x100   : > { %769 = vst.msk [vmem:[%s1284_s9 + $0x28] sm:$0xff] %vm747_vm0, %v736_v62  ;;  %768 = vst.msk [vmem:[%s1284_s9 + $0x20] sm:$0xff] %vm747_vm0, %v735_v7  ;;  %v612_v37 = vmul.f32 10.0, %v596_v8  ;;  %v611_v53 = vmul.f32 10.0, %v595_v4  ;;  %v568_v18 = vmul.f32 %v1268_v27, %v502_v25  ;;  %v567_v19 = vmul.f32 %v1270_v38, %v500_v61 }
 0x101   : > { %v722_v16 = vmul.f32 %v706_v9, %v1222_v40  ;;  %v721_v39 = vmul.f32 %v705_v2, %v1225_v26  ;;  %v582_v24 = vsub.f32 1.0, %v566_v14  ;;  %v581_v29 = vsub.f32 1.0, %v565_v15  ;;  %v506_v40 = vpop.xlane.xlu1 %505  ;;  %v504_v26 = vpop.xlane.xlu0 %503 }
 0x102   : > { %v628_v23 = vsub.f32 0.2, %v612_v37  ;;  %v676_v34 = vmul.f32 %v612_v37, %v612_v37  ;;  %757 = vst.msk [vmem:[%s1246_s6 + $0x48] sm:$0xff] %vm747_vm0, %v612_v37  ;;  %v627_v30 = vsub.f32 0.2, %v611_v53  ;;  %v675_v33 = vmul.f32 %v611_v53, %v611_v53  ;;  %756 = vst.msk [vmem:[%s1246_s6 + $0x40] sm:$0xff] %vm747_vm0, %v611_v53 }
 0x103   : > { %v738_v5 = vadd.f32 %v722_v16, %v690_v59  ;;  %v737_v27 = vadd.f32 %v721_v39, %v689_v20  ;;  %v598_v3 = vadd.f32 1e-08, %v582_v24  ;;  %v597_v38 = vadd.f32 1e-08, %v581_v29 }
 0x104   : > { %v644_v11 = vmax.f32 %v628_v23, 0.0  ;;  %v692_v17 = vmul.f32 %v676_v34, %v660_v54  ;;  %v643_v21 = vmax.f32 %v627_v30, 0.0  ;;  %v691_v22 = vmul.f32 %v675_v33, %v659_v63 }
 0x105   : > { %771 = vst.msk [vmem:[%s1284_s9 + $0x38] sm:$0xff] %vm747_vm0, %v738_v5  ;;  %770 = vst.msk [vmem:[%s1284_s9 + $0x30] sm:$0xff] %vm747_vm0, %v737_v27  ;;  %v614_v42 = vmul.f32 10.0, %v598_v3  ;;  %v613_v43 = vmul.f32 10.0, %v597_v38  ;;  %v584_v44 = vsub.f32 1.0, %v568_v18  ;;  %v583_v28 = vsub.f32 1.0, %v567_v19 }
 0x106   : > { %v708_v46 = vmul.f32 %v644_v11, %v644_v11  ;;  %v707_v35 = vmul.f32 %v643_v21, %v643_v21  ;;  %v570_v54 = vmul.f32 %v1278_v58, %v506_v40  ;;  %v569_v36 = vmul.f32 %v1290_v10, %v504_v26  ;;  %v521_v19 = vld [vmem:[%s1197_s29 + $0x70] sm:$0xff] }
 0x107   : > { %v630_v48 = vsub.f32 0.2, %v614_v42  ;;  %v678_v31 = vmul.f32 %v614_v42, %v614_v42  ;;  %759 = vst.msk [vmem:[%s1246_s6 + $0x58] sm:$0xff] %vm747_vm0, %v614_v42  ;;  %v629_v63 = vsub.f32 0.2, %v613_v43  ;;  %v677_v49 = vmul.f32 %v613_v43, %v613_v43  ;;  %758 = vst.msk [vmem:[%s1246_s6 + $0x50] sm:$0xff] %vm747_vm0, %v613_v43 }
 0x108   : > { %v724_v32 = vmul.f32 %v708_v46, %v1228_v41  ;;  %v723_v52 = vmul.f32 %v707_v35, %v1234_v45  ;;  %v600_v56 = vadd.f32 1e-08, %v584_v44  ;;  %v599_v57 = vadd.f32 1e-08, %v583_v28 }
 0x109   : > { %v646_v55 = vmax.f32 %v630_v48, 0.0  ;;  %v645_v58 = vmax.f32 %v629_v63, 0.0  ;;  %v664_v10 = vsub.f32 1.0, %v520_v12  ;;  %v663_v6 = vsub.f32 1.0, %v519_v47 }
 0x10a   : > { %v740_v13 = vadd.f32 %v724_v32, %v692_v17  ;;  %v739_v59 = vadd.f32 %v723_v52, %v691_v22  ;;  %v616_v60 = vmul.f32 10.0, %v600_v56  ;;  %v615_v20 = vmul.f32 10.0, %v599_v57 }
 0x10b   : > { %v710_v25 = vmul.f32 %v646_v55, %v646_v55  ;;  %v709_v61 = vmul.f32 %v645_v58, %v645_v58  ;;  %v586_v62 = vsub.f32 1.0, %v570_v54  ;;  %v585_v41 = vsub.f32 1.0, %v569_v36 }
 0x10c   : > { %773 = vst.msk [vmem:[%s1284_s9 + $0x48] sm:$0xff] %vm747_vm0, %v740_v13  ;;  %772 = vst.msk [vmem:[%s1284_s9 + $0x40] sm:$0xff] %vm747_vm0, %v739_v59  ;;  %v694_v45 = vmul.f32 %v678_v31, %v662_v0  ;;  %v693_v7 = vmul.f32 %v677_v49, %v661_v1  ;;  %v632_v8 = vsub.f32 0.2, %v616_v60  ;;  %v631_v4 = vsub.f32 0.2, %v615_v20 }
 0x10d   : > { %761 = vst.msk [vmem:[%s1246_s6 + $0x68] sm:$0xff] %vm747_vm0, %v616_v60  ;;  %760 = vst.msk [vmem:[%s1246_s6 + $0x60] sm:$0xff] %vm747_vm0, %v615_v20  ;;  %v726_v9 = vmul.f32 %v710_v25, %v1237_v50  ;;  %v725_v2 = vmul.f32 %v709_v61, %v1240_v51  ;;  %v602_v14 = vadd.f32 1e-08, %v586_v62  ;;  %v601_v15 = vadd.f32 1e-08, %v585_v41 }
 0x10e   : > { %v648_v37 = vmax.f32 %v632_v8, 0.0  ;;  %v680_v0 = vmul.f32 %v616_v60, %v616_v60  ;;  %v647_v53 = vmax.f32 %v631_v4, 0.0  ;;  %v679_v18 = vmul.f32 %v615_v20, %v615_v20  ;;  %v522_v1 = vld [vmem:[%s1197_s29 + $0x78] sm:$0xff] }
 0x10f   : > { %v742_v16 = vadd.f32 %v726_v9, %v694_v45  ;;  %v741_v39 = vadd.f32 %v725_v2, %v693_v7  ;;  %v618_v24 = vmul.f32 10.0, %v602_v14  ;;  %v617_v29 = vmul.f32 10.0, %v601_v15 }
 0x110   : > { %v712_v23 = vmul.f32 %v648_v37, %v648_v37  ;;  %v711_v50 = vmul.f32 %v647_v53, %v647_v53  ;;  %v666_v51 = vsub.f32 1.0, %v522_v1  ;;  %v665_v30 = vsub.f32 1.0, %v521_v19 }
 0x111   : > { %775 = vst.msk [vmem:[%s1284_s9 + $0x58] sm:$0xff] %vm747_vm0, %v742_v16  ;;  %774 = vst.msk [vmem:[%s1284_s9 + $0x50] sm:$0xff] %vm747_vm0, %v741_v39  ;;  %v634_v34 = vsub.f32 0.2, %v618_v24  ;;  %v633_v33 = vsub.f32 0.2, %v617_v29  ;;  %v696_v5 = vmul.f32 %v680_v0, %v664_v10  ;;  %v695_v3 = vmul.f32 %v679_v18, %v663_v6 }
 0x112   : > { %763 = vst.msk [vmem:[%s1246_s6 + $0x78] sm:$0xff] %vm747_vm0, %v618_v24  ;;  %762 = vst.msk [vmem:[%s1246_s6 + $0x70] sm:$0xff] %vm747_vm0, %v617_v29  ;;  %v728_v27 = vmul.f32 %v712_v23, %v520_v12  ;;  %v727_v38 = vmul.f32 %v711_v50, %v519_v47  ;;  %v682_v26 = vmul.f32 %v618_v24, %v618_v24 }
 0x113   : > { %v650_v40 = vmax.f32 %v634_v34, 0.0  ;;  %v649_v11 = vmax.f32 %v633_v33, 0.0  ;;  %v681_v17 = vmul.f32 %v617_v29, %v617_v29 }
 0x114   : > { %v744_v21 = vadd.f32 %v728_v27, %v696_v5  ;;  %v743_v22 = vadd.f32 %v727_v38, %v695_v3  ;;  %v698_v44 = vmul.f32 %v682_v26, %v666_v51 }
 0x115   : > { %v714_v42 = vmul.f32 %v650_v40, %v650_v40  ;;  %v713_v43 = vmul.f32 %v649_v11, %v649_v11  ;;  %v697_v46 = vmul.f32 %v681_v17, %v665_v30 }
 0x116   : > { %777 = vst.msk [vmem:[%s1284_s9 + $0x68] sm:$0xff] %vm747_vm0, %v744_v21  ;;  %776 = vst.msk [vmem:[%s1284_s9 + $0x60] sm:$0xff] %vm747_vm0, %v743_v22 }
 0x117   : > { %v730_v28 = vmul.f32 %v714_v42, %v522_v1  ;;  %v729_v35 = vmul.f32 %v713_v43, %v521_v19 }
 0x119   : > { %v746_v12 = vadd.f32 %v730_v28, %v698_v44  ;;  %v745_v47 = vadd.f32 %v729_v35, %v697_v46 }
 0x11b   : > { %779 = vst.msk [vmem:[%s1284_s9 + $0x78] sm:$0xff] %vm747_vm0, %v746_v12  ;;  %778 = vst.msk [vmem:[%s1284_s9 + $0x70] sm:$0xff] %vm747_vm0, %v745_v47 }
 0x11c PF: > { %s15_s15 = sadd.s32 1, %s1035_s15  }
 0x11d   : > { %p12_p5 = scmp.ge.s32.totalorder %s15_s15, 4  }
 0x11f   :  { %14 = sbr.rel (!%p12_p5) target bundleno = 1 (0x1), region = 80 }

</bundles_post_ra>
